<compile_context>
chip_gen: v6e
topology: v6e:2x2x1
jax: 0.10.0
libtpu: 0.0.40
codegen_flags: <defaults>
</compile_context>

<pallas_src>
import functools

import jax
import jax.numpy as jnp
from jax import lax
from jax.experimental import pallas as pl
from jax.experimental.pallas import tpu as pltpu

_EPS_LN = 1e-5
_EPS_BN = 1e-5


def _align8(n):
    return (n + 7) // 8 * 8


def _layer_dims(dim, depth):
    dims, d = [], dim
    for _ in range(depth):
        d = int(d * 0.5)          # same per-layer dim halving as the PyTorch module
        dims.append(d)
    return dims


def _build_plan(dim, depth, heads, dim_head, mlp_dim, in_chan, ksize):
    """Row layout of the single packed f32 weight array (shared by packer & kernel)."""
    inner = heads * dim_head
    plan, row, width = [], 0, 0
    d_in = dim
    for d in _layer_dims(dim, depth):
        ent = {}

        def add(name, r, c):
            nonlocal row, width
            ent[name] = (row, r, c)
            row += _align8(r)                 # every block starts 8-sublane aligned
            width = max(width, c)

        add("se", d_in - 1, d)                # even-column selector for the 2x max-pools
        add("wqkv", d, 3 * inner)             # q/k/v projections, q pre-scaled by dh**-0.5
        add("wo", inner, d)                   # attention output projection
        add("w1", d, mlp_dim)                 # FF first linear
        add("w2", mlp_dim, d)                 # FF second linear
        for t in range(ksize):
            add("tap%d" % t, in_chan, in_chan)  # BN-folded conv tap t, (C_out, C_in)
        add("vec", 5, max(d, mlp_dim))        # rows: bo, ln_g, ln_b, b1, b2
        add("cb", in_chan, 1)                 # BN-folded conv bias (per OUTPUT channel)
        plan.append(ent)
        d_in = d
    return plan, row, width


def _erf(x):
    # Abramowitz & Stegun 7.1.26 polynomial erf (|err| < 1.5e-7); exp/mul/add only.
    # TODO(synk): lax.erf is not guaranteed a Mosaic lowering; polynomial kept for safety.
    a1, a2, a3, a4, a5 = 0.254829592, -0.284496736, 1.421413741, -1.453152027, 1.061405429
    p = 0.3275911
    s = jnp.where(x >= 0.0, 1.0, -1.0)
    z = jnp.abs(x)
    t = 1.0 / (1.0 + p * z)
    poly = t * (a1 + t * (a2 + t * (a3 + t * (a4 + t * a5))))
    return s * (1.0 - poly * jnp.exp(-z * z))


def _gelu(x):
    # nn.GELU() default is exact-erf GELU.
    return 0.5 * x * (1.0 + _erf(x * 0.7071067811865476))


def _make_kernel(dim, depth, heads, dim_head, mlp_dim, in_chan, ksize):
    plan, _, _ = _build_plan(dim, depth, heads, dim_head, mlp_dim, in_chan, ksize)
    dims = _layer_dims(dim, depth)
    C = in_chan
    inner = heads * dim_head
    dh = dim_head
    pad = (ksize - 1) // 2

    def kernel(x_ref, wpack_ref, *out_refs):
        feat_refs = out_refs[:depth]
        info_ref = out_refs[depth]

        x = x_ref[0]                                           # (C, D0) f32
        infos = []
        d_in = dim
        for l, d in enumerate(dims):
            ent = plan[l]

            def blk(name):
                off, r, c = ent[name]
                return wpack_ref[off:off + r, 0:c]             # static, 8-aligned loads

            se = blk("se")                                     # (d_in-1, d)
            wqkv = blk("wqkv")                                 # (d, 3*inner), q pre-scaled
            wo = blk("wo")                                     # (inner, d)
            w1 = blk("w1")                                     # (d, mlp)
            w2 = blk("w2")                                     # (mlp, d)
            vec = blk("vec")                                   # (5, >=max(d, mlp))
            cb = blk("cb")                                     # (C, 1)
            bo, ln_g, ln_b = vec[0:1, 0:d], vec[1:2, 0:d], vec[2:3, 0:d]
            b1, b2 = vec[3:4, 0:mlp_dim], vec[4:5, 0:d]

            # ---- x_cg = MaxPool1d(x, 2, 2): pairwise max + ONE even-column selector dot ----
            xm = jnp.maximum(x[:, :d_in - 1], x[:, 1:])
            xcg = jnp.dot(xm, se, preferred_element_type=jnp.float32)       # (C, d)

            # ---- multi-head attention (merged QKV, value-accumulated out-proj) + residual ----
            qkv = jnp.dot(xcg, wqkv, preferred_element_type=jnp.float32)    # (C, 3*inner)
            att = jnp.zeros((C, d), jnp.float32)
            for h in range(heads):                                          # static unroll
                q = qkv[:, h * dh:(h + 1) * dh]
                k_ = qkv[:, inner + h * dh:inner + (h + 1) * dh]
                v_ = qkv[:, 2 * inner + h * dh:2 * inner + (h + 1) * dh]
                dots = lax.dot_general(q, k_, (((1,), (1,)), ((), ())),
                                       preferred_element_type=jnp.float32)  # (C, C)
                m = jnp.max(dots, axis=-1, keepdims=True)
                e = jnp.exp(dots - m)
                p = e * pl.reciprocal(jnp.sum(e, axis=-1, keepdims=True))   # exact recip
                ho = jnp.dot(p, v_, preferred_element_type=jnp.float32)     # (C, dh)
                att = att + jnp.dot(ho, wo[h * dh:(h + 1) * dh, :],
                                    preferred_element_type=jnp.float32)
            xcg = xcg + att + bo

            # ---- Conv1d(C->C, k, 'same') + folded BN: per-tap dot accumulation, no scratch ----
            zp = jnp.zeros((C, pad), jnp.float32)
            xpad = jnp.concatenate([zp, x, zp], axis=-1)                    # (C, d_in + 2*pad)
            conv = None
            for t in range(ksize):                                          # static unroll
                off, _, _ = ent["tap%d" % t]
                wk = wpack_ref[off:off + C, 0:C]                            # (C_out, C_in)
                contrib = jnp.dot(wk, xpad[:, t:t + d_in],
                                  preferred_element_type=jnp.float32)       # (C, d_in)
                conv = contrib if conv is None else conv + contrib
            conv = conv + cb                                                # bias (C,1) bcast
            y = jnp.where(conv > 0.0, conv,
                          jnp.exp(jnp.minimum(conv, 0.0)) - 1.0)            # ELU(alpha=1)

            # ---- x_fg = MaxPool1d(ELU(conv), 2, 2) ----
            ym = jnp.maximum(y[:, :d_in - 1], y[:, 1:])
            xfg = jnp.dot(ym, se, preferred_element_type=jnp.float32)       # (C, d)

            # ---- FeedForward(LayerNorm -> Linear -> GELU -> Linear) + x_fg residual ----
            mu = jnp.mean(xcg, axis=-1, keepdims=True)
            var = jnp.mean(jnp.square(xcg - mu), axis=-1, keepdims=True)
            xn = (xcg - mu) * lax.rsqrt(var + _EPS_LN) * ln_g + ln_b
            h1 = _gelu(jnp.dot(xn, w1, preferred_element_type=jnp.float32) + b1)
            ff = jnp.dot(h1, w2, preferred_element_type=jnp.float32) + b2
            x = ff + xfg                                                    # next layer input

            feat_refs[l][0] = x
            infos.append(jnp.log(jnp.mean(jnp.square(xfg), axis=-1, keepdims=True)))
            d_in = d

        info_ref[0] = jnp.concatenate(infos, axis=-1)                       # (C, depth)

    return kernel


def prepare_wpack(params, *, dim, depth, heads, dim_head, mlp_dim, in_chan, ksize):
    """One-time parameter folding/packing (hoisted out of the per-forward path).

    Folds BatchNorm1d (eval) into the conv taps/bias (scale hits the conv OUTPUT
    channel), folds the softmax scale into Wq, builds the even-column pooling
    selectors, and packs everything into a single (rows, width) f32 array.
    """
    plan, rows, width = _build_plan(dim, depth, heads, dim_head, mlp_dim, in_chan, ksize)
    W = jnp.zeros((rows, width), jnp.float32)
    scale = float(dim_head) ** -0.5
    d_in = dim
    for l, (p, d) in enumerate(zip(params, _layer_dims(dim, depth))):
        ent = plan[l]

        def put(name, arr):
            nonlocal W
            off, r, c = ent[name]
            W = W.at[off:off + r, 0:c].set(jnp.asarray(arr, jnp.float32).reshape(r, c))

        # Even-column selector: pooled[:, j] = pairwise_max[:, 2j].
        r_idx = jnp.arange(d_in - 1, dtype=jnp.int32)[:, None]
        c_idx = jnp.arange(d, dtype=jnp.int32)[None, :]
        put("se", (r_idx == 2 * c_idx).astype(jnp.float32))

        put("wqkv", jnp.concatenate([p["wq"] * scale, p["wk"], p["wv"]], axis=1))
        put("wo", p["wo"])
        put("w1", p["w1"])
        put("w2", p["w2"])

        # BatchNorm1d (eval, running stats) folded into the conv (output-channel scale).
        s = p["bn_g"] / jnp.sqrt(p["bn_var"] + _EPS_BN)                     # (C,)
        for t in range(ksize):
            put("tap%d" % t, p["conv_w"][:, :, t] * s[:, None])             # (C_out, C_in)
        put("cb", ((p["conv_b"] - p["bn_mean"]) * s + p["bn_b"])[:, None])

        off, _, _ = ent["vec"]
        W = W.at[off + 0, 0:d].set(p["bo"].reshape(d))
        W = W.at[off + 1, 0:d].set(p["ln_g"].reshape(d))
        W = W.at[off + 2, 0:d].set(p["ln_b"].reshape(d))
        W = W.at[off + 3, 0:mlp_dim].set(p["b1"].reshape(mlp_dim))
        W = W.at[off + 4, 0:d].set(p["b2"].reshape(d))
        d_in = d
    return W


def init_params(key, dim, depth, heads, dim_head, mlp_dim, in_chan, ksize):
    """Random parameters. Linear weights stored input-major (x @ w), i.e. PyTorch weight.T;
    Conv1d weight in PyTorch layout (C_out, C_in, K)."""
    params = []
    inner = heads * dim_head
    s = 0.1
    for d in _layer_dims(dim, depth):
        key, *ks = jax.random.split(key, 18)
        params.append(dict(
            wq=s * jax.random.normal(ks[0], (d, inner), jnp.float32),
            wk=s * jax.random.normal(ks[1], (d, inner), jnp.float32),
            wv=s * jax.random.normal(ks[2], (d, inner), jnp.float32),
            wo=s * jax.random.normal(ks[3], (inner, d), jnp.float32),
            bo=s * jax.random.normal(ks[4], (d,), jnp.float32),
            ln_g=1.0 + s * jax.random.normal(ks[5], (d,), jnp.float32),
            ln_b=s * jax.random.normal(ks[6], (d,), jnp.float32),
            w1=s * jax.random.normal(ks[7], (d, mlp_dim), jnp.float32),
            b1=s * jax.random.normal(ks[8], (mlp_dim,), jnp.float32),
            w2=s * jax.random.normal(ks[9], (mlp_dim, d), jnp.float32),
            b2=s * jax.random.normal(ks[10], (d,), jnp.float32),
            conv_w=s * jax.random.normal(ks[11], (in_chan, in_chan, ksize), jnp.float32),
            conv_b=s * jax.random.normal(ks[12], (in_chan,), jnp.float32),
            bn_g=1.0 + s * jax.random.normal(ks[13], (in_chan,), jnp.float32),
            bn_b=s * jax.random.normal(ks[14], (in_chan,), jnp.float32),
            bn_mean=s * jax.random.normal(ks[15], (in_chan,), jnp.float32),
            bn_var=1.0 + 0.1 * jnp.abs(jax.random.normal(ks[16], (in_chan,), jnp.float32)),
        ))
    return params


@functools.partial(jax.jit, static_argnames=("dim", "depth", "heads", "dim_head",
                                             "mlp_dim", "in_chan", "ksize"))
def transformer_forward(x, wpack, *, dim, depth, heads, dim_head, mlp_dim, in_chan, ksize):
    """Entire Transformer.forward as ONE fused Pallas call (all layers, all stages)."""
    B, C, D0 = x.shape
    assert C == in_chan and D0 == dim
    assert dim % (2 ** depth) == 0, "MaxPool1d(2,2) requires even lengths at every layer"
    dims = _layer_dims(dim, depth)
    _, rows, width = _build_plan(dim, depth, heads, dim_head, mlp_dim, in_chan, ksize)
    kernel = _make_kernel(dim, depth, heads, dim_head, mlp_dim, in_chan, ksize)

    out_shape = tuple(jax.ShapeDtypeStruct((B, C, d), jnp.float32) for d in dims) \
        + (jax.ShapeDtypeStruct((B, C, depth), jnp.float32),)
    out_specs = tuple(pl.BlockSpec((1, C, d), lambda b: (b, 0, 0)) for d in dims) \
        + (pl.BlockSpec((1, C, depth), lambda b: (b, 0, 0)),)

    outs = pl.pallas_call(
        kernel,
        out_shape=out_shape,
        grid=(B,),
        in_specs=[pl.BlockSpec((1, C, D0), lambda b: (b, 0, 0)),
                  pl.BlockSpec((rows, width), lambda b: (0, 0))],
        out_specs=out_specs,
        compiler_params=pltpu.CompilerParams(
            dimension_semantics=("parallel",)),        # batch axis -> both TCs on v7x
    )(x, wpack)

    dense_feature = list(outs[:depth])
    info = outs[depth]
    dense_ip = [info[:, :, l] for l in range(depth)]
    return dense_feature, dense_ip


if __name__ == "__main__":
    B, in_chan, dim = 2, 4, 64
    depth, heads, dim_head, mlp_dim = 2, 2, 8, 32
    fine_grained_kernel = 11

    key = jax.random.PRNGKey(0)
    kp, kx = jax.random.split(key)
    params = init_params(kp, dim, depth, heads, dim_head, mlp_dim, in_chan,
                         fine_grained_kernel)
    x = jax.random.normal(kx, (B, in_chan, dim), jnp.float32)

    # One-time folding / packing of every parameter into a single array.
    wpack = jax.block_until_ready(
        prepare_wpack(params, dim=dim, depth=depth, heads=heads, dim_head=dim_head,
                      mlp_dim=mlp_dim, in_chan=in_chan, ksize=fine_grained_kernel))

    dense_feature, dense_ip = transformer_forward(
        x, wpack, dim=dim, depth=depth, heads=heads, dim_head=dim_head,
        mlp_dim=mlp_dim, in_chan=in_chan, ksize=fine_grained_kernel)
    for t in dense_feature + dense_ip:
        jax.block_until_ready(t)
    # dense_feature: [(B, in_chan, 32), (B, in_chan, 16)]; dense_ip: [(B, in_chan)] * depth
    # TODO(synk): BatchNorm1d training-mode (batch statistics) parity is not implemented.
    print("KERNEL_OK")
</pallas_src>

<mosaic_0001>
module attributes {stable_mosaic.version = 11 : i64} {
  func.func @kernel(%arg0: i32, %arg1: memref<1x4x64xf32, #tpu.memory_space<vmem>>, %arg2: memref<496x48xf32, #tpu.memory_space<vmem>>, %arg3: memref<1x4x32xf32, #tpu.memory_space<vmem>>, %arg4: memref<1x4x16xf32, #tpu.memory_space<vmem>>, %arg5: memref<1x4x2xf32, #tpu.memory_space<vmem>>) attributes {dimension_semantics = [#tpu.dimension_semantics<parallel>], iteration_bounds = array<i64: 2>, scalar_prefetch = 0 : i64, scratch_operands = 0 : i64, tpu.core_type = #tpu.core_type<tc>, window_params = [{transform_indices = @transform_0, window_bounds = array<i64: 1, 4, 64>}, {pipeline_mode = #tpu.pipeline_mode<synchronous>, transform_indices = @transform_1, window_bounds = array<i64: 496, 48>}, {transform_indices = @transform_2, window_bounds = array<i64: 1, 4, 32>}, {transform_indices = @transform_3, window_bounds = array<i64: 1, 4, 16>}, {transform_indices = @transform_4, window_bounds = array<i64: 1, 4, 2>}]} {
    %c0 = arith.constant 0 : index
    %c0_0 = arith.constant 0 : index
    %c0_1 = arith.constant 0 : index
    %0 = vector.load %arg1[%c0, %c0_0, %c0_1] : memref<1x4x64xf32, #tpu.memory_space<vmem>>, vector<1x4x64xf32>
    %1 = vector.shape_cast %0 : vector<1x4x64xf32> to vector<4x64xf32>
    %c0_2 = arith.constant 0 : index
    %c0_3 = arith.constant 0 : index
    %2 = vector.load %arg2[%c0_2, %c0_3] : memref<496x48xf32, #tpu.memory_space<vmem>>, vector<63x32xf32>
    %c64 = arith.constant 64 : index
    %c0_4 = arith.constant 0 : index
    %3 = vector.load %arg2[%c64, %c0_4] : memref<496x48xf32, #tpu.memory_space<vmem>>, vector<32x48xf32>
    %c96 = arith.constant 96 : index
    %c0_5 = arith.constant 0 : index
    %4 = vector.load %arg2[%c96, %c0_5] : memref<496x48xf32, #tpu.memory_space<vmem>>, vector<16x32xf32>
    %c112 = arith.constant 112 : index
    %c0_6 = arith.constant 0 : index
    %5 = vector.load %arg2[%c112, %c0_6] : memref<496x48xf32, #tpu.memory_space<vmem>>, vector<32x32xf32>
    %c144 = arith.constant 144 : index
    %c0_7 = arith.constant 0 : index
    %6 = vector.load %arg2[%c144, %c0_7] : memref<496x48xf32, #tpu.memory_space<vmem>>, vector<32x32xf32>
    %c264 = arith.constant 264 : index
    %c0_8 = arith.constant 0 : index
    %7 = vector.load %arg2[%c264, %c0_8] : memref<496x48xf32, #tpu.memory_space<vmem>>, vector<5x32xf32>
    %c272 = arith.constant 272 : index
    %c0_9 = arith.constant 0 : index
    %8 = vector.load %arg2[%c272, %c0_9] : memref<496x48xf32, #tpu.memory_space<vmem>>, vector<4x1xf32>
    %9 = vector.extract_strided_slice %7 {offsets = [0, 0], sizes = [1, 32], strides = [1, 1]} : vector<5x32xf32> to vector<1x32xf32>
    %10 = vector.extract_strided_slice %7 {offsets = [1, 0], sizes = [1, 32], strides = [1, 1]} : vector<5x32xf32> to vector<1x32xf32>
    %11 = vector.extract_strided_slice %7 {offsets = [2, 0], sizes = [1, 32], strides = [1, 1]} : vector<5x32xf32> to vector<1x32xf32>
    %12 = vector.extract_strided_slice %7 {offsets = [3, 0], sizes = [1, 32], strides = [1, 1]} : vector<5x32xf32> to vector<1x32xf32>
    %13 = vector.extract_strided_slice %7 {offsets = [4, 0], sizes = [1, 32], strides = [1, 1]} : vector<5x32xf32> to vector<1x32xf32>
    %14 = vector.extract_strided_slice %1 {offsets = [0, 0], sizes = [4, 63], strides = [1, 1]} : vector<4x64xf32> to vector<4x63xf32>
    %15 = vector.extract_strided_slice %1 {offsets = [0, 1], sizes = [4, 63], strides = [1, 1]} : vector<4x64xf32> to vector<4x63xf32>
    %16 = arith.maximumf %14, %15 : vector<4x63xf32>
    %cst = arith.constant dense<0.000000e+00> : vector<4x32xf32>
    %17 = tpu.matmul %16, %2, %cst {dimension_numbers = #tpu.dot_dimension_numbers<[1], [0], [0], [1], [0, 0, 1, 1], [], []>} : vector<4x63xf32>, vector<63x32xf32>, vector<4x32xf32> -> vector<4x32xf32>
    %cst_10 = arith.constant dense<0.000000e+00> : vector<4x48xf32>
    %18 = tpu.matmul %17, %3, %cst_10 {dimension_numbers = #tpu.dot_dimension_numbers<[1], [0], [0], [1], [0, 0, 1, 1], [], []>} : vector<4x32xf32>, vector<32x48xf32>, vector<4x48xf32> -> vector<4x48xf32>
    %cst_11 = arith.constant 0.000000e+00 : f32
    %19 = vector.broadcast %cst_11 : f32 to vector<4x32xf32>
    %20 = vector.extract_strided_slice %18 {offsets = [0, 0], sizes = [4, 8], strides = [1, 1]} : vector<4x48xf32> to vector<4x8xf32>
    %21 = vector.extract_strided_slice %18 {offsets = [0, 16], sizes = [4, 8], strides = [1, 1]} : vector<4x48xf32> to vector<4x8xf32>
    %22 = vector.extract_strided_slice %18 {offsets = [0, 32], sizes = [4, 8], strides = [1, 1]} : vector<4x48xf32> to vector<4x8xf32>
    %cst_12 = arith.constant dense<0.000000e+00> : vector<4x4xf32>
    %23 = tpu.matmul %20, %21, %cst_12 {dimension_numbers = #tpu.dot_dimension_numbers<[1], [1], [0], [0], [0, 0, 1, 0], [], []>} : vector<4x8xf32>, vector<4x8xf32>, vector<4x4xf32> -> vector<4x4xf32>
    %cst_13 = arith.constant dense<0xFF800000> : vector<4xf32>
    %24 = vector.multi_reduction <maximumf>, %23, %cst_13 [1] : vector<4x4xf32> to vector<4xf32>
    %25 = vector.shape_cast %24 : vector<4xf32> to vector<4x1xf32>
    %26 = vector.broadcast %25 : vector<4x1xf32> to vector<4x4xf32>
    %27 = arith.subf %23, %26 : vector<4x4xf32>
    %28 = math.exp %27 : vector<4x4xf32>
    %cst_14 = arith.constant dense<0.000000e+00> : vector<4xf32>
    %29 = vector.multi_reduction <add>, %28, %cst_14 [1] : vector<4x4xf32> to vector<4xf32>
    %30 = vector.shape_cast %29 : vector<4xf32> to vector<4x1xf32>
    %31 = tpu.reciprocal %30 : vector<4x1xf32> -> vector<4x1xf32>
    %32 = vector.broadcast %31 : vector<4x1xf32> to vector<4x4xf32>
    %33 = arith.mulf %28, %32 : vector<4x4xf32>
    %cst_15 = arith.constant dense<0.000000e+00> : vector<4x8xf32>
    %34 = tpu.matmul %33, %22, %cst_15 {dimension_numbers = #tpu.dot_dimension_numbers<[1], [0], [0], [1], [0, 0, 1, 1], [], []>} : vector<4x4xf32>, vector<4x8xf32>, vector<4x8xf32> -> vector<4x8xf32>
    %35 = vector.extract_strided_slice %4 {offsets = [0, 0], sizes = [8, 32], strides = [1, 1]} : vector<16x32xf32> to vector<8x32xf32>
    %cst_16 = arith.constant dense<0.000000e+00> : vector<4x32xf32>
    %36 = tpu.matmul %34, %35, %cst_16 {dimension_numbers = #tpu.dot_dimension_numbers<[1], [0], [0], [1], [0, 0, 1, 1], [], []>} : vector<4x8xf32>, vector<8x32xf32>, vector<4x32xf32> -> vector<4x32xf32>
    %37 = arith.addf %19, %36 : vector<4x32xf32>
    %38 = vector.extract_strided_slice %18 {offsets = [0, 8], sizes = [4, 8], strides = [1, 1]} : vector<4x48xf32> to vector<4x8xf32>
    %39 = vector.extract_strided_slice %18 {offsets = [0, 24], sizes = [4, 8], strides = [1, 1]} : vector<4x48xf32> to vector<4x8xf32>
    %40 = vector.extract_strided_slice %18 {offsets = [0, 40], sizes = [4, 8], strides = [1, 1]} : vector<4x48xf32> to vector<4x8xf32>
    %cst_17 = arith.constant dense<0.000000e+00> : vector<4x4xf32>
    %41 = tpu.matmul %38, %39, %cst_17 {dimension_numbers = #tpu.dot_dimension_numbers<[1], [1], [0], [0], [0, 0, 1, 0], [], []>} : vector<4x8xf32>, vector<4x8xf32>, vector<4x4xf32> -> vector<4x4xf32>
    %cst_18 = arith.constant dense<0xFF800000> : vector<4xf32>
    %42 = vector.multi_reduction <maximumf>, %41, %cst_18 [1] : vector<4x4xf32> to vector<4xf32>
    %43 = vector.shape_cast %42 : vector<4xf32> to vector<4x1xf32>
    %44 = vector.broadcast %43 : vector<4x1xf32> to vector<4x4xf32>
    %45 = arith.subf %41, %44 : vector<4x4xf32>
    %46 = math.exp %45 : vector<4x4xf32>
    %cst_19 = arith.constant dense<0.000000e+00> : vector<4xf32>
    %47 = vector.multi_reduction <add>, %46, %cst_19 [1] : vector<4x4xf32> to vector<4xf32>
    %48 = vector.shape_cast %47 : vector<4xf32> to vector<4x1xf32>
    %49 = tpu.reciprocal %48 : vector<4x1xf32> -> vector<4x1xf32>
    %50 = vector.broadcast %49 : vector<4x1xf32> to vector<4x4xf32>
    %51 = arith.mulf %46, %50 : vector<4x4xf32>
    %cst_20 = arith.constant dense<0.000000e+00> : vector<4x8xf32>
    %52 = tpu.matmul %51, %40, %cst_20 {dimension_numbers = #tpu.dot_dimension_numbers<[1], [0], [0], [1], [0, 0, 1, 1], [], []>} : vector<4x4xf32>, vector<4x8xf32>, vector<4x8xf32> -> vector<4x8xf32>
    %53 = vector.extract_strided_slice %4 {offsets = [8, 0], sizes = [8, 32], strides = [1, 1]} : vector<16x32xf32> to vector<8x32xf32>
    %cst_21 = arith.constant dense<0.000000e+00> : vector<4x32xf32>
    %54 = tpu.matmul %52, %53, %cst_21 {dimension_numbers = #tpu.dot_dimension_numbers<[1], [0], [0], [1], [0, 0, 1, 1], [], []>} : vector<4x8xf32>, vector<8x32xf32>, vector<4x32xf32> -> vector<4x32xf32>
    %55 = arith.addf %37, %54 : vector<4x32xf32>
    %56 = arith.addf %17, %55 : vector<4x32xf32>
    %57 = vector.broadcast %9 : vector<1x32xf32> to vector<4x32xf32>
    %58 = arith.addf %56, %57 : vector<4x32xf32>
    %cst_22 = arith.constant 0.000000e+00 : f32
    %59 = vector.broadcast %cst_22 : f32 to vector<4x5xf32>
    %60 = tpu.concatenate %59, %1, %59 in 1 : vector<4x5xf32>, vector<4x64xf32>, vector<4x5xf32> -> vector<4x74xf32>
    %c176 = arith.constant 176 : index
    %c0_23 = arith.constant 0 : index
    %61 = vector.load %arg2[%c176, %c0_23] : memref<496x48xf32, #tpu.memory_space<vmem>>, vector<4x4xf32>
    %62 = vector.extract_strided_slice %60 {offsets = [0, 0], sizes = [4, 64], strides = [1, 1]} : vector<4x74xf32> to vector<4x64xf32>
    %cst_24 = arith.constant dense<0.000000e+00> : vector<4x64xf32>
    %63 = tpu.matmul %61, %62, %cst_24 {dimension_numbers = #tpu.dot_dimension_numbers<[1], [0], [0], [1], [0, 0, 1, 1], [], []>} : vector<4x4xf32>, vector<4x64xf32>, vector<4x64xf32> -> vector<4x64xf32>
    %c184 = arith.constant 184 : index
    %c0_25 = arith.constant 0 : index
    %64 = vector.load %arg2[%c184, %c0_25] : memref<496x48xf32, #tpu.memory_space<vmem>>, vector<4x4xf32>
    %65 = vector.extract_strided_slice %60 {offsets = [0, 1], sizes = [4, 64], strides = [1, 1]} : vector<4x74xf32> to vector<4x64xf32>
    %cst_26 = arith.constant dense<0.000000e+00> : vector<4x64xf32>
    %66 = tpu.matmul %64, %65, %cst_26 {dimension_numbers = #tpu.dot_dimension_numbers<[1], [0], [0], [1], [0, 0, 1, 1], [], []>} : vector<4x4xf32>, vector<4x64xf32>, vector<4x64xf32> -> vector<4x64xf32>
    %67 = arith.addf %63, %66 : vector<4x64xf32>
    %c192 = arith.constant 192 : index
    %c0_27 = arith.constant 0 : index
    %68 = vector.load %arg2[%c192, %c0_27] : memref<496x48xf32, #tpu.memory_space<vmem>>, vector<4x4xf32>
    %69 = vector.extract_strided_slice %60 {offsets = [0, 2], sizes = [4, 64], strides = [1, 1]} : vector<4x74xf32> to vector<4x64xf32>
    %cst_28 = arith.constant dense<0.000000e+00> : vector<4x64xf32>
    %70 = tpu.matmul %68, %69, %cst_28 {dimension_numbers = #tpu.dot_dimension_numbers<[1], [0], [0], [1], [0, 0, 1, 1], [], []>} : vector<4x4xf32>, vector<4x64xf32>, vector<4x64xf32> -> vector<4x64xf32>
    %71 = arith.addf %67, %70 : vector<4x64xf32>
    %c200 = arith.constant 200 : index
    %c0_29 = arith.constant 0 : index
    %72 = vector.load %arg2[%c200, %c0_29] : memref<496x48xf32, #tpu.memory_space<vmem>>, vector<4x4xf32>
    %73 = vector.extract_strided_slice %60 {offsets = [0, 3], sizes = [4, 64], strides = [1, 1]} : vector<4x74xf32> to vector<4x64xf32>
    %cst_30 = arith.constant dense<0.000000e+00> : vector<4x64xf32>
    %74 = tpu.matmul %72, %73, %cst_30 {dimension_numbers = #tpu.dot_dimension_numbers<[1], [0], [0], [1], [0, 0, 1, 1], [], []>} : vector<4x4xf32>, vector<4x64xf32>, vector<4x64xf32> -> vector<4x64xf32>
    %75 = arith.addf %71, %74 : vector<4x64xf32>
    %c208 = arith.constant 208 : index
    %c0_31 = arith.constant 0 : index
    %76 = vector.load %arg2[%c208, %c0_31] : memref<496x48xf32, #tpu.memory_space<vmem>>, vector<4x4xf32>
    %77 = vector.extract_strided_slice %60 {offsets = [0, 4], sizes = [4, 64], strides = [1, 1]} : vector<4x74xf32> to vector<4x64xf32>
    %cst_32 = arith.constant dense<0.000000e+00> : vector<4x64xf32>
    %78 = tpu.matmul %76, %77, %cst_32 {dimension_numbers = #tpu.dot_dimension_numbers<[1], [0], [0], [1], [0, 0, 1, 1], [], []>} : vector<4x4xf32>, vector<4x64xf32>, vector<4x64xf32> -> vector<4x64xf32>
    %79 = arith.addf %75, %78 : vector<4x64xf32>
    %c216 = arith.constant 216 : index
    %c0_33 = arith.constant 0 : index
    %80 = vector.load %arg2[%c216, %c0_33] : memref<496x48xf32, #tpu.memory_space<vmem>>, vector<4x4xf32>
    %81 = vector.extract_strided_slice %60 {offsets = [0, 5], sizes = [4, 64], strides = [1, 1]} : vector<4x74xf32> to vector<4x64xf32>
    %cst_34 = arith.constant dense<0.000000e+00> : vector<4x64xf32>
    %82 = tpu.matmul %80, %81, %cst_34 {dimension_numbers = #tpu.dot_dimension_numbers<[1], [0], [0], [1], [0, 0, 1, 1], [], []>} : vector<4x4xf32>, vector<4x64xf32>, vector<4x64xf32> -> vector<4x64xf32>
    %83 = arith.addf %79, %82 : vector<4x64xf32>
    %c224 = arith.constant 224 : index
    %c0_35 = arith.constant 0 : index
    %84 = vector.load %arg2[%c224, %c0_35] : memref<496x48xf32, #tpu.memory_space<vmem>>, vector<4x4xf32>
    %85 = vector.extract_strided_slice %60 {offsets = [0, 6], sizes = [4, 64], strides = [1, 1]} : vector<4x74xf32> to vector<4x64xf32>
    %cst_36 = arith.constant dense<0.000000e+00> : vector<4x64xf32>
    %86 = tpu.matmul %84, %85, %cst_36 {dimension_numbers = #tpu.dot_dimension_numbers<[1], [0], [0], [1], [0, 0, 1, 1], [], []>} : vector<4x4xf32>, vector<4x64xf32>, vector<4x64xf32> -> vector<4x64xf32>
    %87 = arith.addf %83, %86 : vector<4x64xf32>
    %c232 = arith.constant 232 : index
    %c0_37 = arith.constant 0 : index
    %88 = vector.load %arg2[%c232, %c0_37] : memref<496x48xf32, #tpu.memory_space<vmem>>, vector<4x4xf32>
    %89 = vector.extract_strided_slice %60 {offsets = [0, 7], sizes = [4, 64], strides = [1, 1]} : vector<4x74xf32> to vector<4x64xf32>
    %cst_38 = arith.constant dense<0.000000e+00> : vector<4x64xf32>
    %90 = tpu.matmul %88, %89, %cst_38 {dimension_numbers = #tpu.dot_dimension_numbers<[1], [0], [0], [1], [0, 0, 1, 1], [], []>} : vector<4x4xf32>, vector<4x64xf32>, vector<4x64xf32> -> vector<4x64xf32>
    %91 = arith.addf %87, %90 : vector<4x64xf32>
    %c240 = arith.constant 240 : index
    %c0_39 = arith.constant 0 : index
    %92 = vector.load %arg2[%c240, %c0_39] : memref<496x48xf32, #tpu.memory_space<vmem>>, vector<4x4xf32>
    %93 = vector.extract_strided_slice %60 {offsets = [0, 8], sizes = [4, 64], strides = [1, 1]} : vector<4x74xf32> to vector<4x64xf32>
    %cst_40 = arith.constant dense<0.000000e+00> : vector<4x64xf32>
    %94 = tpu.matmul %92, %93, %cst_40 {dimension_numbers = #tpu.dot_dimension_numbers<[1], [0], [0], [1], [0, 0, 1, 1], [], []>} : vector<4x4xf32>, vector<4x64xf32>, vector<4x64xf32> -> vector<4x64xf32>
    %95 = arith.addf %91, %94 : vector<4x64xf32>
    %c248 = arith.constant 248 : index
    %c0_41 = arith.constant 0 : index
    %96 = vector.load %arg2[%c248, %c0_41] : memref<496x48xf32, #tpu.memory_space<vmem>>, vector<4x4xf32>
    %97 = vector.extract_strided_slice %60 {offsets = [0, 9], sizes = [4, 64], strides = [1, 1]} : vector<4x74xf32> to vector<4x64xf32>
    %cst_42 = arith.constant dense<0.000000e+00> : vector<4x64xf32>
    %98 = tpu.matmul %96, %97, %cst_42 {dimension_numbers = #tpu.dot_dimension_numbers<[1], [0], [0], [1], [0, 0, 1, 1], [], []>} : vector<4x4xf32>, vector<4x64xf32>, vector<4x64xf32> -> vector<4x64xf32>
    %99 = arith.addf %95, %98 : vector<4x64xf32>
    %c256 = arith.constant 256 : index
    %c0_43 = arith.constant 0 : index
    %100 = vector.load %arg2[%c256, %c0_43] : memref<496x48xf32, #tpu.memory_space<vmem>>, vector<4x4xf32>
    %101 = vector.extract_strided_slice %60 {offsets = [0, 10], sizes = [4, 64], strides = [1, 1]} : vector<4x74xf32> to vector<4x64xf32>
    %cst_44 = arith.constant dense<0.000000e+00> : vector<4x64xf32>
    %102 = tpu.matmul %100, %101, %cst_44 {dimension_numbers = #tpu.dot_dimension_numbers<[1], [0], [0], [1], [0, 0, 1, 1], [], []>} : vector<4x4xf32>, vector<4x64xf32>, vector<4x64xf32> -> vector<4x64xf32>
    %103 = arith.addf %99, %102 : vector<4x64xf32>
    %104 = vector.broadcast %8 : vector<4x1xf32> to vector<4x64xf32>
    %105 = arith.addf %103, %104 : vector<4x64xf32>
    %cst_45 = arith.constant 0.000000e+00 : f32
    %106 = vector.broadcast %cst_45 : f32 to vector<4x64xf32>
    %107 = arith.cmpf ogt, %105, %106 : vector<4x64xf32>
    %cst_46 = arith.constant 0.000000e+00 : f32
    %108 = vector.broadcast %cst_46 : f32 to vector<4x64xf32>
    %109 = arith.minimumf %105, %108 : vector<4x64xf32>
    %110 = math.exp %109 : vector<4x64xf32>
    %cst_47 = arith.constant 1.000000e+00 : f32
    %111 = vector.broadcast %cst_47 : f32 to vector<4x64xf32>
    %112 = arith.subf %110, %111 : vector<4x64xf32>
    %113 = arith.select %107, %105, %112 : vector<4x64xi1>, vector<4x64xf32>
    %114 = vector.extract_strided_slice %113 {offsets = [0, 0], sizes = [4, 63], strides = [1, 1]} : vector<4x64xf32> to vector<4x63xf32>
    %115 = vector.extract_strided_slice %113 {offsets = [0, 1], sizes = [4, 63], strides = [1, 1]} : vector<4x64xf32> to vector<4x63xf32>
    %116 = arith.maximumf %114, %115 : vector<4x63xf32>
    %cst_48 = arith.constant dense<0.000000e+00> : vector<4x32xf32>
    %117 = tpu.matmul %116, %2, %cst_48 {dimension_numbers = #tpu.dot_dimension_numbers<[1], [0], [0], [1], [0, 0, 1, 1], [], []>} : vector<4x63xf32>, vector<63x32xf32>, vector<4x32xf32> -> vector<4x32xf32>
    %cst_49 = arith.constant dense<0.000000e+00> : vector<4xf32>
    %118 = vector.multi_reduction <add>, %58, %cst_49 [1] : vector<4x32xf32> to vector<4xf32>
    %119 = vector.shape_cast %118 : vector<4xf32> to vector<4x1xf32>
    %cst_50 = arith.constant 3.200000e+01 : f32
    %120 = vector.broadcast %cst_50 : f32 to vector<4x1xf32>
    %121 = arith.divf %119, %120 : vector<4x1xf32>
    %122 = vector.broadcast %121 : vector<4x1xf32> to vector<4x32xf32>
    %123 = arith.subf %58, %122 : vector<4x32xf32>
    %124 = arith.mulf %123, %123 : vector<4x32xf32>
    %cst_51 = arith.constant dense<0.000000e+00> : vector<4xf32>
    %125 = vector.multi_reduction <add>, %124, %cst_51 [1] : vector<4x32xf32> to vector<4xf32>
    %126 = vector.shape_cast %125 : vector<4xf32> to vector<4x1xf32>
    %cst_52 = arith.constant 3.200000e+01 : f32
    %127 = vector.broadcast %cst_52 : f32 to vector<4x1xf32>
    %128 = arith.divf %126, %127 : vector<4x1xf32>
    %129 = vector.broadcast %121 : vector<4x1xf32> to vector<4x32xf32>
    %130 = arith.subf %58, %129 : vector<4x32xf32>
    %cst_53 = arith.constant 9.99999974E-6 : f32
    %131 = vector.broadcast %cst_53 : f32 to vector<4x1xf32>
    %132 = arith.addf %128, %131 : vector<4x1xf32>
    %133 = math.rsqrt %132 : vector<4x1xf32>
    %134 = vector.broadcast %133 : vector<4x1xf32> to vector<4x32xf32>
    %135 = arith.mulf %130, %134 : vector<4x32xf32>
    %136 = vector.broadcast %10 : vector<1x32xf32> to vector<4x32xf32>
    %137 = arith.mulf %135, %136 : vector<4x32xf32>
    %138 = vector.broadcast %11 : vector<1x32xf32> to vector<4x32xf32>
    %139 = arith.addf %137, %138 : vector<4x32xf32>
    %cst_54 = arith.constant dense<0.000000e+00> : vector<4x32xf32>
    %140 = tpu.matmul %139, %5, %cst_54 {dimension_numbers = #tpu.dot_dimension_numbers<[1], [0], [0], [1], [0, 0, 1, 1], [], []>} : vector<4x32xf32>, vector<32x32xf32>, vector<4x32xf32> -> vector<4x32xf32>
    %141 = vector.broadcast %12 : vector<1x32xf32> to vector<4x32xf32>
    %142 = arith.addf %140, %141 : vector<4x32xf32>
    %cst_55 = arith.constant 5.000000e-01 : f32
    %143 = vector.broadcast %cst_55 : f32 to vector<4x32xf32>
    %144 = arith.mulf %143, %142 : vector<4x32xf32>
    %cst_56 = arith.constant 0.707106769 : f32
    %145 = vector.broadcast %cst_56 : f32 to vector<4x32xf32>
    %146 = arith.mulf %142, %145 : vector<4x32xf32>
    %cst_57 = arith.constant 0.000000e+00 : f32
    %147 = vector.broadcast %cst_57 : f32 to vector<4x32xf32>
    %148 = arith.cmpf oge, %146, %147 : vector<4x32xf32>
    %cst_58 = arith.constant 1.000000e+00 : f32
    %cst_59 = arith.constant -1.000000e+00 : f32
    %149 = vector.broadcast %cst_58 : f32 to vector<4x32xf32>
    %150 = vector.broadcast %cst_59 : f32 to vector<4x32xf32>
    %151 = arith.select %148, %149, %150 : vector<4x32xi1>, vector<4x32xf32>
    %152 = math.absf %146 : vector<4x32xf32>
    %cst_60 = arith.constant 0.327591091 : f32
    %153 = vector.broadcast %cst_60 : f32 to vector<4x32xf32>
    %154 = arith.mulf %153, %152 : vector<4x32xf32>
    %cst_61 = arith.constant 1.000000e+00 : f32
    %155 = vector.broadcast %cst_61 : f32 to vector<4x32xf32>
    %156 = arith.addf %155, %154 : vector<4x32xf32>
    %cst_62 = arith.constant 1.000000e+00 : f32
    %157 = vector.broadcast %cst_62 : f32 to vector<4x32xf32>
    %158 = arith.divf %157, %156 : vector<4x32xf32>
    %cst_63 = arith.constant 1.06140542 : f32
    %159 = vector.broadcast %cst_63 : f32 to vector<4x32xf32>
    %160 = arith.mulf %158, %159 : vector<4x32xf32>
    %cst_64 = arith.constant -1.45315206 : f32
    %161 = vector.broadcast %cst_64 : f32 to vector<4x32xf32>
    %162 = arith.addf %161, %160 : vector<4x32xf32>
    %163 = arith.mulf %158, %162 : vector<4x32xf32>
    %cst_65 = arith.constant 1.42141378 : f32
    %164 = vector.broadcast %cst_65 : f32 to vector<4x32xf32>
    %165 = arith.addf %164, %163 : vector<4x32xf32>
    %166 = arith.mulf %158, %165 : vector<4x32xf32>
    %cst_66 = arith.constant -0.284496725 : f32
    %167 = vector.broadcast %cst_66 : f32 to vector<4x32xf32>
    %168 = arith.addf %167, %166 : vector<4x32xf32>
    %169 = arith.mulf %158, %168 : vector<4x32xf32>
    %cst_67 = arith.constant 0.254829586 : f32
    %170 = vector.broadcast %cst_67 : f32 to vector<4x32xf32>
    %171 = arith.addf %170, %169 : vector<4x32xf32>
    %172 = arith.mulf %158, %171 : vector<4x32xf32>
    %cst_68 = arith.constant 0.000000e+00 : f32
    %173 = vector.broadcast %cst_68 : f32 to vector<4x32xf32>
    %174 = arith.subf %173, %152 : vector<4x32xf32>
    %175 = arith.mulf %174, %152 : vector<4x32xf32>
    %176 = math.exp %175 : vector<4x32xf32>
    %177 = arith.mulf %172, %176 : vector<4x32xf32>
    %cst_69 = arith.constant 1.000000e+00 : f32
    %178 = vector.broadcast %cst_69 : f32 to vector<4x32xf32>
    %179 = arith.subf %178, %177 : vector<4x32xf32>
    %180 = arith.mulf %151, %179 : vector<4x32xf32>
    %cst_70 = arith.constant 1.000000e+00 : f32
    %181 = vector.broadcast %cst_70 : f32 to vector<4x32xf32>
    %182 = arith.addf %181, %180 : vector<4x32xf32>
    %183 = arith.mulf %144, %182 : vector<4x32xf32>
    %cst_71 = arith.constant dense<0.000000e+00> : vector<4x32xf32>
    %184 = tpu.matmul %183, %6, %cst_71 {dimension_numbers = #tpu.dot_dimension_numbers<[1], [0], [0], [1], [0, 0, 1, 1], [], []>} : vector<4x32xf32>, vector<32x32xf32>, vector<4x32xf32> -> vector<4x32xf32>
    %185 = vector.broadcast %13 : vector<1x32xf32> to vector<4x32xf32>
    %186 = arith.addf %184, %185 : vector<4x32xf32>
    %187 = arith.addf %186, %117 : vector<4x32xf32>
    %c0_72 = arith.constant 0 : index
    %c0_73 = arith.constant 0 : index
    %c0_74 = arith.constant 0 : index
    %188 = vector.load %arg3[%c0_72, %c0_73, %c0_74] : memref<1x4x32xf32, #tpu.memory_space<vmem>>, vector<1x4x32xf32>
    %189 = vector.shape_cast %188 : vector<1x4x32xf32> to vector<4x32xf32>
    %190 = vector.shape_cast %187 : vector<4x32xf32> to vector<1x4x32xf32>
    tpu.vector_store %arg3[%c0_72, %c0_73, %c0_74], %190 {strides = array<i32>} : memref<1x4x32xf32, #tpu.memory_space<vmem>>, vector<1x4x32xf32>,
    %191 = arith.mulf %117, %117 : vector<4x32xf32>
    %cst_75 = arith.constant dense<0.000000e+00> : vector<4xf32>
    %192 = vector.multi_reduction <add>, %191, %cst_75 [1] : vector<4x32xf32> to vector<4xf32>
    %193 = vector.shape_cast %192 : vector<4xf32> to vector<4x1xf32>
    %cst_76 = arith.constant 3.200000e+01 : f32
    %194 = vector.broadcast %cst_76 : f32 to vector<4x1xf32>
    %195 = arith.divf %193, %194 : vector<4x1xf32>
    %196 = math.log %195 : vector<4x1xf32>
    %c280 = arith.constant 280 : index
    %c0_77 = arith.constant 0 : index
    %197 = vector.load %arg2[%c280, %c0_77] : memref<496x48xf32, #tpu.memory_space<vmem>>, vector<31x16xf32>
    %c312 = arith.constant 312 : index
    %c0_78 = arith.constant 0 : index
    %198 = vector.load %arg2[%c312, %c0_78] : memref<496x48xf32, #tpu.memory_space<vmem>>, vector<16x48xf32>
    %c328 = arith.constant 328 : index
    %c0_79 = arith.constant 0 : index
    %199 = vector.load %arg2[%c328, %c0_79] : memref<496x48xf32, #tpu.memory_space<vmem>>, vector<16x16xf32>
    %c344 = arith.constant 344 : index
    %c0_80 = arith.constant 0 : index
    %200 = vector.load %arg2[%c344, %c0_80] : memref<496x48xf32, #tpu.memory_space<vmem>>, vector<16x32xf32>
    %c360 = arith.constant 360 : index
    %c0_81 = arith.constant 0 : index
    %201 = vector.load %arg2[%c360, %c0_81] : memref<496x48xf32, #tpu.memory_space<vmem>>, vector<32x16xf32>
    %c480 = arith.constant 480 : index
    %c0_82 = arith.constant 0 : index
    %202 = vector.load %arg2[%c480, %c0_82] : memref<496x48xf32, #tpu.memory_space<vmem>>, vector<5x32xf32>
    %c488 = arith.constant 488 : index
    %c0_83 = arith.constant 0 : index
    %203 = vector.load %arg2[%c488, %c0_83] : memref<496x48xf32, #tpu.memory_space<vmem>>, vector<4x1xf32>
    %204 = vector.extract_strided_slice %202 {offsets = [0, 0], sizes = [1, 16], strides = [1, 1]} : vector<5x32xf32> to vector<1x16xf32>
    %205 = vector.extract_strided_slice %202 {offsets = [1, 0], sizes = [1, 16], strides = [1, 1]} : vector<5x32xf32> to vector<1x16xf32>
    %206 = vector.extract_strided_slice %202 {offsets = [2, 0], sizes = [1, 16], strides = [1, 1]} : vector<5x32xf32> to vector<1x16xf32>
    %207 = vector.extract_strided_slice %202 {offsets = [3, 0], sizes = [1, 32], strides = [1, 1]} : vector<5x32xf32> to vector<1x32xf32>
    %208 = vector.extract_strided_slice %202 {offsets = [4, 0], sizes = [1, 16], strides = [1, 1]} : vector<5x32xf32> to vector<1x16xf32>
    %209 = vector.extract_strided_slice %187 {offsets = [0, 0], sizes = [4, 31], strides = [1, 1]} : vector<4x32xf32> to vector<4x31xf32>
    %210 = vector.extract_strided_slice %187 {offsets = [0, 1], sizes = [4, 31], strides = [1, 1]} : vector<4x32xf32> to vector<4x31xf32>
    %211 = arith.maximumf %209, %210 : vector<4x31xf32>
    %cst_84 = arith.constant dense<0.000000e+00> : vector<4x16xf32>
    %212 = tpu.matmul %211, %197, %cst_84 {dimension_numbers = #tpu.dot_dimension_numbers<[1], [0], [0], [1], [0, 0, 1, 1], [], []>} : vector<4x31xf32>, vector<31x16xf32>, vector<4x16xf32> -> vector<4x16xf32>
    %cst_85 = arith.constant dense<0.000000e+00> : vector<4x48xf32>
    %213 = tpu.matmul %212, %198, %cst_85 {dimension_numbers = #tpu.dot_dimension_numbers<[1], [0], [0], [1], [0, 0, 1, 1], [], []>} : vector<4x16xf32>, vector<16x48xf32>, vector<4x48xf32> -> vector<4x48xf32>
    %cst_86 = arith.constant 0.000000e+00 : f32
    %214 = vector.broadcast %cst_86 : f32 to vector<4x16xf32>
    %215 = vector.extract_strided_slice %213 {offsets = [0, 0], sizes = [4, 8], strides = [1, 1]} : vector<4x48xf32> to vector<4x8xf32>
    %216 = vector.extract_strided_slice %213 {offsets = [0, 16], sizes = [4, 8], strides = [1, 1]} : vector<4x48xf32> to vector<4x8xf32>
    %217 = vector.extract_strided_slice %213 {offsets = [0, 32], sizes = [4, 8], strides = [1, 1]} : vector<4x48xf32> to vector<4x8xf32>
    %cst_87 = arith.constant dense<0.000000e+00> : vector<4x4xf32>
    %218 = tpu.matmul %215, %216, %cst_87 {dimension_numbers = #tpu.dot_dimension_numbers<[1], [1], [0], [0], [0, 0, 1, 0], [], []>} : vector<4x8xf32>, vector<4x8xf32>, vector<4x4xf32> -> vector<4x4xf32>
    %cst_88 = arith.constant dense<0xFF800000> : vector<4xf32>
    %219 = vector.multi_reduction <maximumf>, %218, %cst_88 [1] : vector<4x4xf32> to vector<4xf32>
    %220 = vector.shape_cast %219 : vector<4xf32> to vector<4x1xf32>
    %221 = vector.broadcast %220 : vector<4x1xf32> to vector<4x4xf32>
    %222 = arith.subf %218, %221 : vector<4x4xf32>
    %223 = math.exp %222 : vector<4x4xf32>
    %cst_89 = arith.constant dense<0.000000e+00> : vector<4xf32>
    %224 = vector.multi_reduction <add>, %223, %cst_89 [1] : vector<4x4xf32> to vector<4xf32>
    %225 = vector.shape_cast %224 : vector<4xf32> to vector<4x1xf32>
    %226 = tpu.reciprocal %225 : vector<4x1xf32> -> vector<4x1xf32>
    %227 = vector.broadcast %226 : vector<4x1xf32> to vector<4x4xf32>
    %228 = arith.mulf %223, %227 : vector<4x4xf32>
    %cst_90 = arith.constant dense<0.000000e+00> : vector<4x8xf32>
    %229 = tpu.matmul %228, %217, %cst_90 {dimension_numbers = #tpu.dot_dimension_numbers<[1], [0], [0], [1], [0, 0, 1, 1], [], []>} : vector<4x4xf32>, vector<4x8xf32>, vector<4x8xf32> -> vector<4x8xf32>
    %230 = vector.extract_strided_slice %199 {offsets = [0, 0], sizes = [8, 16], strides = [1, 1]} : vector<16x16xf32> to vector<8x16xf32>
    %cst_91 = arith.constant dense<0.000000e+00> : vector<4x16xf32>
    %231 = tpu.matmul %229, %230, %cst_91 {dimension_numbers = #tpu.dot_dimension_numbers<[1], [0], [0], [1], [0, 0, 1, 1], [], []>} : vector<4x8xf32>, vector<8x16xf32>, vector<4x16xf32> -> vector<4x16xf32>
    %232 = arith.addf %214, %231 : vector<4x16xf32>
    %233 = vector.extract_strided_slice %213 {offsets = [0, 8], sizes = [4, 8], strides = [1, 1]} : vector<4x48xf32> to vector<4x8xf32>
    %234 = vector.extract_strided_slice %213 {offsets = [0, 24], sizes = [4, 8], strides = [1, 1]} : vector<4x48xf32> to vector<4x8xf32>
    %235 = vector.extract_strided_slice %213 {offsets = [0, 40], sizes = [4, 8], strides = [1, 1]} : vector<4x48xf32> to vector<4x8xf32>
    %cst_92 = arith.constant dense<0.000000e+00> : vector<4x4xf32>
    %236 = tpu.matmul %233, %234, %cst_92 {dimension_numbers = #tpu.dot_dimension_numbers<[1], [1], [0], [0], [0, 0, 1, 0], [], []>} : vector<4x8xf32>, vector<4x8xf32>, vector<4x4xf32> -> vector<4x4xf32>
    %cst_93 = arith.constant dense<0xFF800000> : vector<4xf32>
    %237 = vector.multi_reduction <maximumf>, %236, %cst_93 [1] : vector<4x4xf32> to vector<4xf32>
    %238 = vector.shape_cast %237 : vector<4xf32> to vector<4x1xf32>
    %239 = vector.broadcast %238 : vector<4x1xf32> to vector<4x4xf32>
    %240 = arith.subf %236, %239 : vector<4x4xf32>
    %241 = math.exp %240 : vector<4x4xf32>
    %cst_94 = arith.constant dense<0.000000e+00> : vector<4xf32>
    %242 = vector.multi_reduction <add>, %241, %cst_94 [1] : vector<4x4xf32> to vector<4xf32>
    %243 = vector.shape_cast %242 : vector<4xf32> to vector<4x1xf32>
    %244 = tpu.reciprocal %243 : vector<4x1xf32> -> vector<4x1xf32>
    %245 = vector.broadcast %244 : vector<4x1xf32> to vector<4x4xf32>
    %246 = arith.mulf %241, %245 : vector<4x4xf32>
    %cst_95 = arith.constant dense<0.000000e+00> : vector<4x8xf32>
    %247 = tpu.matmul %246, %235, %cst_95 {dimension_numbers = #tpu.dot_dimension_numbers<[1], [0], [0], [1], [0, 0, 1, 1], [], []>} : vector<4x4xf32>, vector<4x8xf32>, vector<4x8xf32> -> vector<4x8xf32>
    %248 = vector.extract_strided_slice %199 {offsets = [8, 0], sizes = [8, 16], strides = [1, 1]} : vector<16x16xf32> to vector<8x16xf32>
    %cst_96 = arith.constant dense<0.000000e+00> : vector<4x16xf32>
    %249 = tpu.matmul %247, %248, %cst_96 {dimension_numbers = #tpu.dot_dimension_numbers<[1], [0], [0], [1], [0, 0, 1, 1], [], []>} : vector<4x8xf32>, vector<8x16xf32>, vector<4x16xf32> -> vector<4x16xf32>
    %250 = arith.addf %232, %249 : vector<4x16xf32>
    %251 = arith.addf %212, %250 : vector<4x16xf32>
    %252 = vector.broadcast %204 : vector<1x16xf32> to vector<4x16xf32>
    %253 = arith.addf %251, %252 : vector<4x16xf32>
    %cst_97 = arith.constant 0.000000e+00 : f32
    %254 = vector.broadcast %cst_97 : f32 to vector<4x5xf32>
    %255 = tpu.concatenate %254, %187, %254 in 1 : vector<4x5xf32>, vector<4x32xf32>, vector<4x5xf32> -> vector<4x42xf32>
    %c392 = arith.constant 392 : index
    %c0_98 = arith.constant 0 : index
    %256 = vector.load %arg2[%c392, %c0_98] : memref<496x48xf32, #tpu.memory_space<vmem>>, vector<4x4xf32>
    %257 = vector.extract_strided_slice %255 {offsets = [0, 0], sizes = [4, 32], strides = [1, 1]} : vector<4x42xf32> to vector<4x32xf32>
    %cst_99 = arith.constant dense<0.000000e+00> : vector<4x32xf32>
    %258 = tpu.matmul %256, %257, %cst_99 {dimension_numbers = #tpu.dot_dimension_numbers<[1], [0], [0], [1], [0, 0, 1, 1], [], []>} : vector<4x4xf32>, vector<4x32xf32>, vector<4x32xf32> -> vector<4x32xf32>
    %c400 = arith.constant 400 : index
    %c0_100 = arith.constant 0 : index
    %259 = vector.load %arg2[%c400, %c0_100] : memref<496x48xf32, #tpu.memory_space<vmem>>, vector<4x4xf32>
    %260 = vector.extract_strided_slice %255 {offsets = [0, 1], sizes = [4, 32], strides = [1, 1]} : vector<4x42xf32> to vector<4x32xf32>
    %cst_101 = arith.constant dense<0.000000e+00> : vector<4x32xf32>
    %261 = tpu.matmul %259, %260, %cst_101 {dimension_numbers = #tpu.dot_dimension_numbers<[1], [0], [0], [1], [0, 0, 1, 1], [], []>} : vector<4x4xf32>, vector<4x32xf32>, vector<4x32xf32> -> vector<4x32xf32>
    %262 = arith.addf %258, %261 : vector<4x32xf32>
    %c408 = arith.constant 408 : index
    %c0_102 = arith.constant 0 : index
    %263 = vector.load %arg2[%c408, %c0_102] : memref<496x48xf32, #tpu.memory_space<vmem>>, vector<4x4xf32>
    %264 = vector.extract_strided_slice %255 {offsets = [0, 2], sizes = [4, 32], strides = [1, 1]} : vector<4x42xf32> to vector<4x32xf32>
    %cst_103 = arith.constant dense<0.000000e+00> : vector<4x32xf32>
    %265 = tpu.matmul %263, %264, %cst_103 {dimension_numbers = #tpu.dot_dimension_numbers<[1], [0], [0], [1], [0, 0, 1, 1], [], []>} : vector<4x4xf32>, vector<4x32xf32>, vector<4x32xf32> -> vector<4x32xf32>
    %266 = arith.addf %262, %265 : vector<4x32xf32>
    %c416 = arith.constant 416 : index
    %c0_104 = arith.constant 0 : index
    %267 = vector.load %arg2[%c416, %c0_104] : memref<496x48xf32, #tpu.memory_space<vmem>>, vector<4x4xf32>
    %268 = vector.extract_strided_slice %255 {offsets = [0, 3], sizes = [4, 32], strides = [1, 1]} : vector<4x42xf32> to vector<4x32xf32>
    %cst_105 = arith.constant dense<0.000000e+00> : vector<4x32xf32>
    %269 = tpu.matmul %267, %268, %cst_105 {dimension_numbers = #tpu.dot_dimension_numbers<[1], [0], [0], [1], [0, 0, 1, 1], [], []>} : vector<4x4xf32>, vector<4x32xf32>, vector<4x32xf32> -> vector<4x32xf32>
    %270 = arith.addf %266, %269 : vector<4x32xf32>
    %c424 = arith.constant 424 : index
    %c0_106 = arith.constant 0 : index
    %271 = vector.load %arg2[%c424, %c0_106] : memref<496x48xf32, #tpu.memory_space<vmem>>, vector<4x4xf32>
    %272 = vector.extract_strided_slice %255 {offsets = [0, 4], sizes = [4, 32], strides = [1, 1]} : vector<4x42xf32> to vector<4x32xf32>
    %cst_107 = arith.constant dense<0.000000e+00> : vector<4x32xf32>
    %273 = tpu.matmul %271, %272, %cst_107 {dimension_numbers = #tpu.dot_dimension_numbers<[1], [0], [0], [1], [0, 0, 1, 1], [], []>} : vector<4x4xf32>, vector<4x32xf32>, vector<4x32xf32> -> vector<4x32xf32>
    %274 = arith.addf %270, %273 : vector<4x32xf32>
    %c432 = arith.constant 432 : index
    %c0_108 = arith.constant 0 : index
    %275 = vector.load %arg2[%c432, %c0_108] : memref<496x48xf32, #tpu.memory_space<vmem>>, vector<4x4xf32>
    %276 = vector.extract_strided_slice %255 {offsets = [0, 5], sizes = [4, 32], strides = [1, 1]} : vector<4x42xf32> to vector<4x32xf32>
    %cst_109 = arith.constant dense<0.000000e+00> : vector<4x32xf32>
    %277 = tpu.matmul %275, %276, %cst_109 {dimension_numbers = #tpu.dot_dimension_numbers<[1], [0], [0], [1], [0, 0, 1, 1], [], []>} : vector<4x4xf32>, vector<4x32xf32>, vector<4x32xf32> -> vector<4x32xf32>
    %278 = arith.addf %274, %277 : vector<4x32xf32>
    %c440 = arith.constant 440 : index
    %c0_110 = arith.constant 0 : index
    %279 = vector.load %arg2[%c440, %c0_110] : memref<496x48xf32, #tpu.memory_space<vmem>>, vector<4x4xf32>
    %280 = vector.extract_strided_slice %255 {offsets = [0, 6], sizes = [4, 32], strides = [1, 1]} : vector<4x42xf32> to vector<4x32xf32>
    %cst_111 = arith.constant dense<0.000000e+00> : vector<4x32xf32>
    %281 = tpu.matmul %279, %280, %cst_111 {dimension_numbers = #tpu.dot_dimension_numbers<[1], [0], [0], [1], [0, 0, 1, 1], [], []>} : vector<4x4xf32>, vector<4x32xf32>, vector<4x32xf32> -> vector<4x32xf32>
    %282 = arith.addf %278, %281 : vector<4x32xf32>
    %c448 = arith.constant 448 : index
    %c0_112 = arith.constant 0 : index
    %283 = vector.load %arg2[%c448, %c0_112] : memref<496x48xf32, #tpu.memory_space<vmem>>, vector<4x4xf32>
    %284 = vector.extract_strided_slice %255 {offsets = [0, 7], sizes = [4, 32], strides = [1, 1]} : vector<4x42xf32> to vector<4x32xf32>
    %cst_113 = arith.constant dense<0.000000e+00> : vector<4x32xf32>
    %285 = tpu.matmul %283, %284, %cst_113 {dimension_numbers = #tpu.dot_dimension_numbers<[1], [0], [0], [1], [0, 0, 1, 1], [], []>} : vector<4x4xf32>, vector<4x32xf32>, vector<4x32xf32> -> vector<4x32xf32>
    %286 = arith.addf %282, %285 : vector<4x32xf32>
    %c456 = arith.constant 456 : index
    %c0_114 = arith.constant 0 : index
    %287 = vector.load %arg2[%c456, %c0_114] : memref<496x48xf32, #tpu.memory_space<vmem>>, vector<4x4xf32>
    %288 = vector.extract_strided_slice %255 {offsets = [0, 8], sizes = [4, 32], strides = [1, 1]} : vector<4x42xf32> to vector<4x32xf32>
    %cst_115 = arith.constant dense<0.000000e+00> : vector<4x32xf32>
    %289 = tpu.matmul %287, %288, %cst_115 {dimension_numbers = #tpu.dot_dimension_numbers<[1], [0], [0], [1], [0, 0, 1, 1], [], []>} : vector<4x4xf32>, vector<4x32xf32>, vector<4x32xf32> -> vector<4x32xf32>
    %290 = arith.addf %286, %289 : vector<4x32xf32>
    %c464 = arith.constant 464 : index
    %c0_116 = arith.constant 0 : index
    %291 = vector.load %arg2[%c464, %c0_116] : memref<496x48xf32, #tpu.memory_space<vmem>>, vector<4x4xf32>
    %292 = vector.extract_strided_slice %255 {offsets = [0, 9], sizes = [4, 32], strides = [1, 1]} : vector<4x42xf32> to vector<4x32xf32>
    %cst_117 = arith.constant dense<0.000000e+00> : vector<4x32xf32>
    %293 = tpu.matmul %291, %292, %cst_117 {dimension_numbers = #tpu.dot_dimension_numbers<[1], [0], [0], [1], [0, 0, 1, 1], [], []>} : vector<4x4xf32>, vector<4x32xf32>, vector<4x32xf32> -> vector<4x32xf32>
    %294 = arith.addf %290, %293 : vector<4x32xf32>
    %c472 = arith.constant 472 : index
    %c0_118 = arith.constant 0 : index
    %295 = vector.load %arg2[%c472, %c0_118] : memref<496x48xf32, #tpu.memory_space<vmem>>, vector<4x4xf32>
    %296 = vector.extract_strided_slice %255 {offsets = [0, 10], sizes = [4, 32], strides = [1, 1]} : vector<4x42xf32> to vector<4x32xf32>
    %cst_119 = arith.constant dense<0.000000e+00> : vector<4x32xf32>
    %297 = tpu.matmul %295, %296, %cst_119 {dimension_numbers = #tpu.dot_dimension_numbers<[1], [0], [0], [1], [0, 0, 1, 1], [], []>} : vector<4x4xf32>, vector<4x32xf32>, vector<4x32xf32> -> vector<4x32xf32>
    %298 = arith.addf %294, %297 : vector<4x32xf32>
    %299 = vector.broadcast %203 : vector<4x1xf32> to vector<4x32xf32>
    %300 = arith.addf %298, %299 : vector<4x32xf32>
    %cst_120 = arith.constant 0.000000e+00 : f32
    %301 = vector.broadcast %cst_120 : f32 to vector<4x32xf32>
    %302 = arith.cmpf ogt, %300, %301 : vector<4x32xf32>
    %cst_121 = arith.constant 0.000000e+00 : f32
    %303 = vector.broadcast %cst_121 : f32 to vector<4x32xf32>
    %304 = arith.minimumf %300, %303 : vector<4x32xf32>
    %305 = math.exp %304 : vector<4x32xf32>
    %cst_122 = arith.constant 1.000000e+00 : f32
    %306 = vector.broadcast %cst_122 : f32 to vector<4x32xf32>
    %307 = arith.subf %305, %306 : vector<4x32xf32>
    %308 = arith.select %302, %300, %307 : vector<4x32xi1>, vector<4x32xf32>
    %309 = vector.extract_strided_slice %308 {offsets = [0, 0], sizes = [4, 31], strides = [1, 1]} : vector<4x32xf32> to vector<4x31xf32>
    %310 = vector.extract_strided_slice %308 {offsets = [0, 1], sizes = [4, 31], strides = [1, 1]} : vector<4x32xf32> to vector<4x31xf32>
    %311 = arith.maximumf %309, %310 : vector<4x31xf32>
    %cst_123 = arith.constant dense<0.000000e+00> : vector<4x16xf32>
    %312 = tpu.matmul %311, %197, %cst_123 {dimension_numbers = #tpu.dot_dimension_numbers<[1], [0], [0], [1], [0, 0, 1, 1], [], []>} : vector<4x31xf32>, vector<31x16xf32>, vector<4x16xf32> -> vector<4x16xf32>
    %cst_124 = arith.constant dense<0.000000e+00> : vector<4xf32>
    %313 = vector.multi_reduction <add>, %253, %cst_124 [1] : vector<4x16xf32> to vector<4xf32>
    %314 = vector.shape_cast %313 : vector<4xf32> to vector<4x1xf32>
    %cst_125 = arith.constant 1.600000e+01 : f32
    %315 = vector.broadcast %cst_125 : f32 to vector<4x1xf32>
    %316 = arith.divf %314, %315 : vector<4x1xf32>
    %317 = vector.broadcast %316 : vector<4x1xf32> to vector<4x16xf32>
    %318 = arith.subf %253, %317 : vector<4x16xf32>
    %319 = arith.mulf %318, %318 : vector<4x16xf32>
    %cst_126 = arith.constant dense<0.000000e+00> : vector<4xf32>
    %320 = vector.multi_reduction <add>, %319, %cst_126 [1] : vector<4x16xf32> to vector<4xf32>
    %321 = vector.shape_cast %320 : vector<4xf32> to vector<4x1xf32>
    %cst_127 = arith.constant 1.600000e+01 : f32
    %322 = vector.broadcast %cst_127 : f32 to vector<4x1xf32>
    %323 = arith.divf %321, %322 : vector<4x1xf32>
    %324 = vector.broadcast %316 : vector<4x1xf32> to vector<4x16xf32>
    %325 = arith.subf %253, %324 : vector<4x16xf32>
    %cst_128 = arith.constant 9.99999974E-6 : f32
    %326 = vector.broadcast %cst_128 : f32 to vector<4x1xf32>
    %327 = arith.addf %323, %326 : vector<4x1xf32>
    %328 = math.rsqrt %327 : vector<4x1xf32>
    %329 = vector.broadcast %328 : vector<4x1xf32> to vector<4x16xf32>
    %330 = arith.mulf %325, %329 : vector<4x16xf32>
    %331 = vector.broadcast %205 : vector<1x16xf32> to vector<4x16xf32>
    %332 = arith.mulf %330, %331 : vector<4x16xf32>
    %333 = vector.broadcast %206 : vector<1x16xf32> to vector<4x16xf32>
    %334 = arith.addf %332, %333 : vector<4x16xf32>
    %cst_129 = arith.constant dense<0.000000e+00> : vector<4x32xf32>
    %335 = tpu.matmul %334, %200, %cst_129 {dimension_numbers = #tpu.dot_dimension_numbers<[1], [0], [0], [1], [0, 0, 1, 1], [], []>} : vector<4x16xf32>, vector<16x32xf32>, vector<4x32xf32> -> vector<4x32xf32>
    %336 = vector.broadcast %207 : vector<1x32xf32> to vector<4x32xf32>
    %337 = arith.addf %335, %336 : vector<4x32xf32>
    %cst_130 = arith.constant 5.000000e-01 : f32
    %338 = vector.broadcast %cst_130 : f32 to vector<4x32xf32>
    %339 = arith.mulf %338, %337 : vector<4x32xf32>
    %cst_131 = arith.constant 0.707106769 : f32
    %340 = vector.broadcast %cst_131 : f32 to vector<4x32xf32>
    %341 = arith.mulf %337, %340 : vector<4x32xf32>
    %cst_132 = arith.constant 0.000000e+00 : f32
    %342 = vector.broadcast %cst_132 : f32 to vector<4x32xf32>
    %343 = arith.cmpf oge, %341, %342 : vector<4x32xf32>
    %cst_133 = arith.constant 1.000000e+00 : f32
    %cst_134 = arith.constant -1.000000e+00 : f32
    %344 = vector.broadcast %cst_133 : f32 to vector<4x32xf32>
    %345 = vector.broadcast %cst_134 : f32 to vector<4x32xf32>
    %346 = arith.select %343, %344, %345 : vector<4x32xi1>, vector<4x32xf32>
    %347 = math.absf %341 : vector<4x32xf32>
    %cst_135 = arith.constant 0.327591091 : f32
    %348 = vector.broadcast %cst_135 : f32 to vector<4x32xf32>
    %349 = arith.mulf %348, %347 : vector<4x32xf32>
    %cst_136 = arith.constant 1.000000e+00 : f32
    %350 = vector.broadcast %cst_136 : f32 to vector<4x32xf32>
    %351 = arith.addf %350, %349 : vector<4x32xf32>
    %cst_137 = arith.constant 1.000000e+00 : f32
    %352 = vector.broadcast %cst_137 : f32 to vector<4x32xf32>
    %353 = arith.divf %352, %351 : vector<4x32xf32>
    %cst_138 = arith.constant 1.06140542 : f32
    %354 = vector.broadcast %cst_138 : f32 to vector<4x32xf32>
    %355 = arith.mulf %353, %354 : vector<4x32xf32>
    %cst_139 = arith.constant -1.45315206 : f32
    %356 = vector.broadcast %cst_139 : f32 to vector<4x32xf32>
    %357 = arith.addf %356, %355 : vector<4x32xf32>
    %358 = arith.mulf %353, %357 : vector<4x32xf32>
    %cst_140 = arith.constant 1.42141378 : f32
    %359 = vector.broadcast %cst_140 : f32 to vector<4x32xf32>
    %360 = arith.addf %359, %358 : vector<4x32xf32>
    %361 = arith.mulf %353, %360 : vector<4x32xf32>
    %cst_141 = arith.constant -0.284496725 : f32
    %362 = vector.broadcast %cst_141 : f32 to vector<4x32xf32>
    %363 = arith.addf %362, %361 : vector<4x32xf32>
    %364 = arith.mulf %353, %363 : vector<4x32xf32>
    %cst_142 = arith.constant 0.254829586 : f32
    %365 = vector.broadcast %cst_142 : f32 to vector<4x32xf32>
    %366 = arith.addf %365, %364 : vector<4x32xf32>
    %367 = arith.mulf %353, %366 : vector<4x32xf32>
    %cst_143 = arith.constant 0.000000e+00 : f32
    %368 = vector.broadcast %cst_143 : f32 to vector<4x32xf32>
    %369 = arith.subf %368, %347 : vector<4x32xf32>
    %370 = arith.mulf %369, %347 : vector<4x32xf32>
    %371 = math.exp %370 : vector<4x32xf32>
    %372 = arith.mulf %367, %371 : vector<4x32xf32>
    %cst_144 = arith.constant 1.000000e+00 : f32
    %373 = vector.broadcast %cst_144 : f32 to vector<4x32xf32>
    %374 = arith.subf %373, %372 : vector<4x32xf32>
    %375 = arith.mulf %346, %374 : vector<4x32xf32>
    %cst_145 = arith.constant 1.000000e+00 : f32
    %376 = vector.broadcast %cst_145 : f32 to vector<4x32xf32>
    %377 = arith.addf %376, %375 : vector<4x32xf32>
    %378 = arith.mulf %339, %377 : vector<4x32xf32>
    %cst_146 = arith.constant dense<0.000000e+00> : vector<4x16xf32>
    %379 = tpu.matmul %378, %201, %cst_146 {dimension_numbers = #tpu.dot_dimension_numbers<[1], [0], [0], [1], [0, 0, 1, 1], [], []>} : vector<4x32xf32>, vector<32x16xf32>, vector<4x16xf32> -> vector<4x16xf32>
    %380 = vector.broadcast %208 : vector<1x16xf32> to vector<4x16xf32>
    %381 = arith.addf %379, %380 : vector<4x16xf32>
    %382 = arith.addf %381, %312 : vector<4x16xf32>
    %c0_147 = arith.constant 0 : index
    %c0_148 = arith.constant 0 : index
    %c0_149 = arith.constant 0 : index
    %383 = vector.load %arg4[%c0_147, %c0_148, %c0_149] : memref<1x4x16xf32, #tpu.memory_space<vmem>>, vector<1x4x16xf32>
    %384 = vector.shape_cast %383 : vector<1x4x16xf32> to vector<4x16xf32>
    %385 = vector.shape_cast %382 : vector<4x16xf32> to vector<1x4x16xf32>
    tpu.vector_store %arg4[%c0_147, %c0_148, %c0_149], %385 {strides = array<i32>} : memref<1x4x16xf32, #tpu.memory_space<vmem>>, vector<1x4x16xf32>,
    %386 = arith.mulf %312, %312 : vector<4x16xf32>
    %cst_150 = arith.constant dense<0.000000e+00> : vector<4xf32>
    %387 = vector.multi_reduction <add>, %386, %cst_150 [1] : vector<4x16xf32> to vector<4xf32>
    %388 = vector.shape_cast %387 : vector<4xf32> to vector<4x1xf32>
    %cst_151 = arith.constant 1.600000e+01 : f32
    %389 = vector.broadcast %cst_151 : f32 to vector<4x1xf32>
    %390 = arith.divf %388, %389 : vector<4x1xf32>
    %391 = math.log %390 : vector<4x1xf32>
    %392 = tpu.concatenate %196, %391 in 1 : vector<4x1xf32>, vector<4x1xf32> -> vector<4x2xf32>
    %c0_152 = arith.constant 0 : index
    %c0_153 = arith.constant 0 : index
    %c0_154 = arith.constant 0 : index
    %393 = vector.load %arg5[%c0_152, %c0_153, %c0_154] : memref<1x4x2xf32, #tpu.memory_space<vmem>>, vector<1x4x2xf32>
    %394 = vector.shape_cast %393 : vector<1x4x2xf32> to vector<4x2xf32>
    %395 = vector.shape_cast %392 : vector<4x2xf32> to vector<1x4x2xf32>
    tpu.vector_store %arg5[%c0_152, %c0_153, %c0_154], %395 {strides = array<i32>} : memref<1x4x2xf32, #tpu.memory_space<vmem>>, vector<1x4x2xf32>,
    return
  }
  func.func @transform_0(%arg0: i32) -> (i32, i32, i32) {
    %c0_i32 = arith.constant 0 : i32
    %c0_i32_0 = arith.constant 0 : i32
    %c0_i32_1 = arith.constant 0 : i32
    return %arg0, %c0_i32, %c0_i32_0 : i32, i32, i32
  }
  func.func @transform_1(%arg0: i32) -> (i32, i32) {
    %c0_i32 = arith.constant 0 : i32
    %c0_i32_0 = arith.constant 0 : i32
    %c0_i32_1 = arith.constant 0 : i32
    return %c0_i32, %c0_i32_0 : i32, i32
  }
  func.func @transform_2(%arg0: i32) -> (i32, i32, i32) {
    %c0_i32 = arith.constant 0 : i32
    %c0_i32_0 = arith.constant 0 : i32
    %c0_i32_1 = arith.constant 0 : i32
    return %arg0, %c0_i32, %c0_i32_0 : i32, i32, i32
  }
  func.func @transform_3(%arg0: i32) -> (i32, i32, i32) {
    %c0_i32 = arith.constant 0 : i32
    %c0_i32_0 = arith.constant 0 : i32
    %c0_i32_1 = arith.constant 0 : i32
    return %arg0, %c0_i32, %c0_i32_0 : i32, i32, i32
  }
  func.func @transform_4(%arg0: i32) -> (i32, i32, i32) {
    %c0_i32 = arith.constant 0 : i32
    %c0_i32_0 = arith.constant 0 : i32
    %c0_i32_1 = arith.constant 0 : i32
    return %arg0, %c0_i32, %c0_i32_0 : i32, i32, i32
  }
}

</mosaic_0001>

<bundles_post_ra>
// kernel: transformer_forward.1
= control target key start
LH: loop header
LB: loop body
LE: loop exit
PB: predicated region body
PF: predicated region fallthrough
CT: control target
= control target key end

     0   :  { %10 = vsyncpa [#allocation3], 0  ;;  %s5531_s0 = inlined_call_operand.vmem [shape: f32[2,4,64], index: 0, kind: input, shape index: {}]   ;;  %s5532_s1 = inlined_call_operand.vmem [shape: f32[496,48], index: 1, kind: input, shape index: {}]   ;;  %s5533_s2 = inlined_call_operand.hbm [shape: f32[2,4,32], index: 2, kind: output, shape index: {0}]   ;;  %s5534_s3 = inlined_call_operand.hbm [shape: f32[2,4,16], index: 3, kind: output, shape index: {1}]   ;;  %s5535_s4 = inlined_call_operand.vmem [shape: f32[2,4,2], index: 4, kind: output, shape index: {2}]  }
   0x1   :  { %12 = vsyncpa [#allocation3 + $0x1], 0 }
   0x2   :  { %13 = vsyncpa [#allocation5], 0 }
   0x3   :  { %15 = vsyncpa [#allocation5 + $0x1], 0  ;;  %s4793_s15 = smov 0   ;;  %s4795_s16 = smov 0  }
   0x4   :  { %s4797_s17 = smov 0   ;;  %s4799_s18 = smov 0  }
   0x5 LB: > { %s4814_s19 = sadd.s32 4294967295, %s4745_s18   ;;  %s4051_s20 = sadd.s32 4294967294, %s4745_s18   ;;  %s4745_s18 = sphi %s4799_s18, %s5553_s18   ;;  %s4741_s17 = sphi %s4797_s17, %s5552_s17   ;;  %s4737_s16 = sphi %s4795_s16, %s5551_s16   ;;  %s4733_s15 = sphi %s4793_s15, %s5550_s15  }
   0x6   : > { %s4818_s21 = sadd.s32 1, %s4745_s18   ;;  %s75_s22 = sadd.s32 1, %s4741_s17 }
   0x7   : > { %s72_s23 = ssub.s32 %s4745_s18, %s4818_s21  ;;  %p85_p0 = scmp.ne.s32.totalorder %s4741_s17, %s4737_s16 }
   0x8   : > { %p73_p1 = scmp.eq.s32.totalorder %s72_s23, 0  ;;  %p86_p2 = scmp.eq.s32.totalorder %s4814_s19, 1 }
   0x9   : > { %p91_p3 = scmp.ne.s32.totalorder %s4737_s16, %s4733_s15  ;;  %p92_p4 = scmp.eq.s32.totalorder %s4051_s20, 1 }
   0xa   : > { %s4829_s24 = scalar_select %p73_p1, %s4741_s17, %s75_s22  }
   0xb   : > { %p4831_p5 = por %p86_p2, %p85_p0  ;;  %p4835_p6 = por %p92_p4, %p91_p3 }
   0xc   : > { %p4054_p7 = scmp.ge.s32.totalorder %s4745_s18, 1  ;;  %p172_p8 = scmp.lt.s32.totalorder %s4745_s18, 3 }
   0xe   : > { %p173_p9 = pnand %p4054_p7, %p172_p8 }
   0xf   : > { %p206_p10 = scmp.lt.s32.totalorder (!%p173_p9), %s4814_s19, 1  ;;  %s4749_s29 = smov (!%p173_p9), 127  }
  0x10   : > { %176 = sbr.rel (%p173_p9) target bundleno = 5160 (0x1428), region = 28  ;;  %s4750_s22 = smov (!%p173_p9), 112  }
  0x11   : > { %s4751_s23 = smov (!%p173_p9), 96   ;;  %s4752_s27 = smov (!%p173_p9), 120  }
  0x12   : > { %s4753_s28 = smov (!%p173_p9), 104   ;;  %s4754_s30 = smov (!%p173_p9), 88  }
  0x13   : > { %s4755_s13 = smov (!%p173_p9), 5   ;;  %s5537_s6 = smov (!%p173_p9), 123  }
  0x14   : > { %s4757_s7 = smov (!%p173_p9), 121   ;;  %s4758_s8 = smov (!%p173_p9), 126  }
  0x15   : > { %v4845_v0 = vld [vmem:[%s5532_s1 + $0x38] sm:$0x7f]  ;;  %vm248_vm0 = vcmask 1046528   ;;  %v4747_v1 = vmov 0.0   ;;  %v4851_v2 = vld [vmem:[%s5532_s1 + $0x30] sm:$0xff]  ;;  %s4855_s5 = scalar_select %p206_p10, %s4814_s19, 1  ;;  %v878_v55 = vlaneseq }
  0x16   : > { %4267 = vmatprep.subr.mxu0 %v4747_v1  ;;  %4286 = vmatprep.subr.mxu1 %v4747_v1  ;;  %vm4748_vm1 = vmmov 0   ;;  %v4865_v3 = vld [vmem:[%s5532_s1 + $0x28] sm:$0xff]  ;;  %v226_v4 = vld [vmem:[%s5532_s1 + $0x58] sm:$0xff]  ;;  %v225_v5 = vld [vmem:[%s5532_s1 + $0x50] sm:$0xff]  ;;  %vm244_vm2 = vcmask 515072   ;;  %vm322_vm3 = vcmask 261120  }
  0x17   : > { %4268 = vmatpush3.msk.msra.mxu0 %vm248_vm0, %v4845_v0  ;;  %4283 = vmatprep.mubr.msk.f32.mxu0 %vm4748_vm1, %v4747_v1  ;;  %s5536_s12 = sshll.u32 %s4855_s5, 2  ;;  %v4886_v6 = vld [vmem:[%s5532_s1 + $0x20] sm:$0xff]  ;;  %v224_v8 = vld [vmem:[%s5532_s1 + $0x48] sm:$0xff]  ;;  %v4901_v9 = vld [vmem:[%s5532_s1 + $0x18] sm:$0xff]  ;;  %vm399_vm4 = vcmask 64512   ;;  %vm492_vm5 = vcmask 1043456  }
  0x18   : > { %4269 = vmatprep.subr.mxu0 %v4747_v1  ;;  %4294 = vmatprep.mubr.msk.f32.mxu1 %vm4748_vm1, %v4747_v1  ;;  %s209_s20 = scalar_lea.vmem %s5531_s0, %s5536_s12  ;;  %v4909_v10 = vld [vmem:[%s5532_s1 + $0x10] sm:$0xff]  ;;  %v4917_v11 = vld [vmem:[%s5532_s1 + $0x8] sm:$0xff]  ;;  %v4924_v12 = vld [vmem:[%s5532_s1] sm:$0xff]  ;;  %vm474_vm6 = vcmask 27648   ;;  %vm488_vm7 = vcmask 31744   ;;  %v4987_v56 = vshrl.u32 %v878_v55, 7 }
  0x19   : > { %4270 = vmatpush3.msra.mxu0 %v4851_v2  ;;  %4287 = vmatpush3.msra.mxu1 %v226_v4  ;;  %v4889_v7 = vld [vmem:[%s209_s20] sm:$0xf]  ;;  %v228_v50 = vld [vmem:[%s5532_s1 + $0x68] sm:$0xff]  ;;  %vm1846_vm8 = vcmask 257024   ;;  %vm886_vm9 = vcmask 39936   ;;  %vm888_vm10 = vcmask 564224  }
  0x1a   : > { %4271 = vmatprep.subr.mxu0 %v4747_v1  ;;  %4288 = vmatprep.subr.mxu1 %v4747_v1  ;;  %v223_v15 = vld [vmem:[%s5532_s1 + $0x40] sm:$0xff]  ;;  %v880_v57 = vsub.s32 0, %v4987_v56  ;;  %v4993_v58 = vld [vmem:[%s5532_s1 + $0x108] sm:$0x1f]  ;;  %s4759_s9 = smov 125   ;;  %s5541_s10 = smov 124  }
  0x1b   : > { %4272 = vmatpush3.msra.mxu0 %v4865_v3  ;;  %4289 = vmatpush3.msra.mxu1 %v225_v5  ;;  %v227_v49 = vld [vmem:[%s5532_s1 + $0x60] sm:$0xff]  ;;  %s5538_s11 = smov 122   ;;  %s5539_s14 = smov 119   ;;  %v236_v55 = vld [vmem:[%s5532_s1 + $0xa8] sm:$0xff]  ;;  %vm2082_vm13 = vcmask 252928   ;;  %vm2159_vm14 = vcmask 130048  }
  0x1c   : > { %240 = vrot.lane.b32.xlu0 %v4889_v7, %s4749_s29  ;;  %4273 = vmatprep.subr.mxu0 %v4747_v1  ;;  %v881_v61 = vrot.slane %v4993_v58, %v880_v57  ;;  %s5540_s20 = smov 118   ;;  %s5217_s12 = sand.u32 1, %s4737_s16   ;;  %vm2720_vm15 = vcmask 302080  }
  0x1d   : > { %4274 = vmatpush3.msra.mxu0 %v4886_v6  ;;  %4290 = vmatprep.subr.mxu1 %v4747_v1 }
  0x1e   : > { %4275 = vmatprep.subr.mxu0 %v4747_v1  ;;  %4291 = vmatpush3.msra.mxu1 %v224_v8 }
  0x1f   : > { %4276 = vmatpush3.msra.mxu0 %v4901_v9  ;;  %4292 = vmatprep.subr.mxu1 %v4747_v1 }
  0x20   : > { %4277 = vmatprep.subr.mxu0 %v4747_v1  ;;  %4293 = vmatpush3.msra.mxu1 %v223_v15 }
  0x21   : > { %4278 = vmatpush3.msra.mxu0 %v4909_v10  ;;  %4297 = vmatprep.subr.mxu1 %v4747_v1 }
  0x22   : > { %4279 = vmatprep.subr.mxu0 %v4747_v1 }
  0x23   : > { %4280 = vmatpush3.msra.mxu0 %v4917_v11 }
  0x24   : > { %4281 = vmatprep.subr.mxu0 %v4747_v1 }
  0x25   : > { %4282 = vmatpush3.msra.mxu0 %v4924_v12 }
  0x26   : > { %4317 = vmatprep.subr.mxu0 %v4747_v1 }
  0x8e   : > { %v241_v13 = vpop.permute.xlu0 %240 }
  0x8f   : > { %v243_v14 = vmax.f32 %v4889_v7, %v241_v13 }
  0x91   : > { %4284 = vmatmul.mubr.msk.f32.vlgmr.msra.gmra.mxu0 %vm244_vm2, %v243_v14 }
  0x92   : > { %4319 = vmatprep.mubr.msk.f32.mxu0 %vm4748_vm1, %v4747_v1  ;;  %4318 = vmatpush3.msra.mxu0 %v228_v50 }
  0x93   : > { %4327 = vmatprep.subr.mxu0 %v4747_v1 }
 0x151   : > { %v4938_v16 = vpop.f32.mrf.mxu0 }
 0x152   : > { %4295 = vmatmul.mubr.msk.f32.vlgmr.msra.gmra.mxu1 %vm322_vm3, %v4938_v16 }
 0x153   : > { %v4285_v17 = vpop.f32.mrf.mxu0  ;;  %4299 = vmatprep.mubr.msk.f32.mxu1 %vm4748_vm1, %v4747_v1 }
 0x212   : > { %v392_v18 = vpop.f32.mrf.mxu1 }
 0x213   : > { %397 = vrot.lane.b32.xlu0 %v392_v18, %s4750_s22 }
 0x214   : > { %v4296_v19 = vpop.f32.mrf.mxu1 }
 0x217   : > { %486 = vrot.lane.b32.xlu0 %v392_v18, %s4751_s23 }
 0x21b   : > { %565 = vrot.lane.b32.xlu0 %v392_v18, %s4752_s27 }
 0x285   : > { %v398_v20 = vpop.permute.xlu0 %397 }
 0x286   : > { %4298 = vmatpush3.xpose.msk.msra.mxu1 %vm399_vm4, %v398_v20  ;;  %v238_v20 = vld [vmem:[%s5532_s1 + $0x110] sm:$0xf] }
 0x287   : > { %4302 = vmatprep.subr.mxu1 %v4747_v1 }
 0x289   : > { %4300 = vmatmul.mubr.msk.f32.vlgmr.msra.gmra.mxu1 %vm399_vm4, %v392_v18  ;;  %v487_v21 = vpop.permute.xlu0 %486 }
 0x28a   : > { %4303 = vmatpush3.msk.msra.mxu1 %vm492_vm5, %v487_v21  ;;  %4304 = vmatprep.mubr.msk.f32.mxu1 %vm4748_vm1, %v4747_v1  ;;  %v4764_v21 = vmov 0  }
 0x28b   : > { %4307 = vmatprep.subr.mxu1 %v4747_v1  ;;  %4618 = vset.pattern.permute.xlu0 %v4764_v21 }
 0x28d   : > { %v566_v34 = vpop.permute.xlu0 %565 }
 0x349   : > { %v470_v22 = vpop.f32.mrf.mxu1 }
 0x34a   : > { %v475_v23 = vsel %vm474_vm6, %v470_v22, -inf }
 0x34b   : > { %476 = vmax.xlane.f32.xlu1 %v475_v23  ;;  %v4301_v24 = vpop.f32.mrf.mxu1 }
 0x34c   : > { %v1045_v24 = vld [vmem:[%s5532_s1 + $0xc0] sm:$0xf] }
 0x3d4   : > { %v477_v25 = vpop.xlane.xlu1 %476 }
 0x3d5   : > { %v478_v26 = vsub.f32 %v470_v22, %v477_v25  ;;  %v891_v22 = vld [vmem:[%s5532_s1 + $0xb8] sm:$0xf] }
 0x3d7   : > { %v479_v27 = vmul.f32 1.442695, %v478_v26  ;;  %v1124_v26 = vld [vmem:[%s5532_s1 + $0xc8] sm:$0xf] }
 0x3d9   : > { %4619 = vpow2.f32 %v479_v27 }
 0x3e6   : > { %v4620_v28 = vpop.eup %4619 }
 0x3e7   : > { %v481_v29 = vsel %vm474_vm6, %v4620_v28, 0.0 }
 0x3e8   : > { %482 = vadd.xlane.f32.xlu1 %v481_v29  ;;  %v1282_v29 = vld [vmem:[%s5532_s1 + $0xd8] sm:$0xf] }
 0x3f9   : > { %567 = vrot.lane.b32.xlu1 %v392_v18, %s4753_s28 }
 0x471   : > { %v483_v30 = vpop.xlane.xlu1 %482 }
 0x472   : > { %4621 = vrcp.f32 %v483_v30 }
 0x475   : > { %v568_v33 = vpop.permute.xlu1 %567 }
 0x47f   : > { %v4622_v31 = vpop.eup %4621 }
 0x480   : > { %v485_v32 = vmul.f32 %v4622_v31, %v4620_v28  ;;  %v1203_v31 = vld [vmem:[%s5532_s1 + $0xd0] sm:$0xf] }
 0x482   : > { %4305 = vmatmul.mubr.msk.f32.vlgmr.msra.gmra.mxu1 %vm488_vm7, %v485_v32 }
 0x483   : > { %4308 = vmatpush3.xpose.msk.msra.mxu1 %vm399_vm4, %v568_v33  ;;  %4309 = vmatprep.mubr.msk.f32.mxu1 %vm4748_vm1, %v4747_v1  ;;  %v1440_v33 = vld [vmem:[%s5532_s1 + $0xe8] sm:$0xf] }
 0x484   : > { %4312 = vmatprep.subr.mxu1 %v4747_v1 }
 0x486   : > { %4310 = vmatmul.mubr.msk.f32.vlgmr.msra.gmra.mxu1 %vm399_vm4, %v566_v34 }
 0x487   : > { %4314 = vmatprep.mubr.msk.f32.mxu1 %vm4748_vm1, %v4747_v1 }
 0x542   : > { %v561_v35 = vpop.f32.mrf.mxu1 }
 0x544   : > { %v4306_v36 = vpop.f32.mrf.mxu1 }
 0x546   : > { %v639_v37 = vpop.f32.mrf.mxu1 }
 0x547   : > { %v643_v38 = vsel %vm474_vm6, %v639_v37, -inf }
 0x548   : > { %644 = vmax.xlane.f32.xlu0 %v643_v38  ;;  %v4311_v39 = vpop.f32.mrf.mxu1  ;;  %v1598_v38 = vld [vmem:[%s5532_s1 + $0xf8] sm:$0xf] }
 0x55e   : > { %654 = vrot.lane.b32.xlu0 %v392_v18, %s4754_s30 }
 0x5d1   : > { %v645_v40 = vpop.xlane.xlu0 %644 }
 0x5d2   : > { %v646_v41 = vsub.f32 %v639_v37, %v645_v40  ;;  %v1519_v37 = vld [vmem:[%s5532_s1 + $0xf0] sm:$0xf]  ;;  %v1677_v40 = vld [vmem:[%s5532_s1 + $0x100] sm:$0xf] }
 0x5d4   : > { %v647_v42 = vmul.f32 1.442695, %v646_v41 }
 0x5d5   : > { %v655_v43 = vpop.permute.xlu0 %654 }
 0x5d6   : > { %4623 = vpow2.f32 %v647_v42  ;;  %4313 = vmatpush3.msk.msra.mxu1 %vm492_vm5, %v655_v43  ;;  %v232_v42 = vld [vmem:[%s5532_s1 + $0x88] sm:$0xff]  ;;  %v230_v43 = vld [vmem:[%s5532_s1 + $0x78] sm:$0xff] }
 0x5d7   : > { %4322 = vmatprep.subr.mxu1 %v4747_v1 }
 0x5e3   : > { %v4624_v44 = vpop.eup %4623 }
 0x5e4   : > { %v649_v45 = vsel %vm474_vm6, %v4624_v44, 0.0 }
 0x5e5   : > { %650 = vadd.xlane.f32.xlu1 %v649_v45  ;;  %v1868_v45 = vsub.s32 2, %v4987_v56 }
 0x66e   : > { %v651_v46 = vpop.xlane.xlu1 %650 }
 0x66f   : > { %4625 = vrcp.f32 %v651_v46 }
 0x67c   : > { %v4626_v47 = vpop.eup %4625 }
 0x67d   : > { %v653_v48 = vmul.f32 %v4626_v47, %v4624_v44 }
 0x67f   : > { %4315 = vmatmul.mubr.msk.f32.vlgmr.msra.gmra.mxu1 %vm488_vm7, %v653_v48 }
 0x680   : > { %4323 = vmatpush3.msra.mxu1 %v227_v49  ;;  %4324 = vmatprep.mubr.msk.f32.mxu1 %vm4748_vm1, %v4747_v1 }
 0x681   : > { %4332 = vmatprep.subr.mxu1 %v4747_v1 }
 0x683   : > { %4325 = vmatmul.mubr.msk.f32.vlgmr.msra.gmra.mxu1 %vm399_vm4, %v561_v35  ;;  %v1361_v35 = vld [vmem:[%s5532_s1 + $0xe0] sm:$0xf] }
 0x684   : > { %4334 = vmatprep.mubr.msk.f32.mxu1 %vm4748_vm1, %v4747_v1 }
 0x73f   : > { %v727_v51 = vpop.f32.mrf.mxu1 }
 0x740   : > { %4320 = vmatmul.mubr.msk.f32.vlgmr.msra.gmra.mxu0 %vm399_vm4, %v727_v51 }
 0x741   : > { %v4316_v52 = vpop.f32.mrf.mxu1  ;;  %4329 = vmatprep.mubr.msk.f32.mxu0 %vm4748_vm1, %v4747_v1 }
 0x743   : > { %v873_v53 = vpop.f32.mrf.mxu1 }
 0x745   : > { %v4326_v54 = vpop.f32.mrf.mxu1 }
 0x800   : > { %v800_v59 = vpop.f32.mrf.mxu0 }
 0x801   : > { %v874_v60 = vadd.f32 %v873_v53, %v800_v59 }
 0x802   : > { %v4321_v62 = vpop.f32.mrf.mxu0 }
 0x803   : > { %v877_v63 = vadd.f32 %v874_v60, %v4938_v16  ;;  %v890_v16 = vld [vmem:[%s5532_s1 + $0xb0] sm:$0xf] }
 0x805   : > { %v882_v4 = vadd.f32 %v881_v61, %v877_v63  ;;  %v235_v61 = vld [vmem:[%s5532_s1 + $0xa0] sm:$0xff]  ;;  %v234_v63 = vld [vmem:[%s5532_s1 + $0x98] sm:$0xff] }
 0x807   : > { %v1847_v5 = vsel %vm1846_vm8, %v882_v4, 0.0 }
 0x808   : > { %1848 = vadd.xlane.f32.xlu1 %v1847_v5 }
 0x819   : > { %883 = vrot.lane.b32.xlu1 %v4889_v7, %s4755_s13 }
 0x891   : > { %v1849_v8 = vpop.xlane.xlu1 %1848 }
 0x892   : > { %v1851_v7 = vmul.f32 0.03125, %v1849_v8 }
 0x894   : > { %v5021_v17 = vsub.f32 %v882_v4, %v1851_v7  ;;  %v233_v4 = vld [vmem:[%s5532_s1 + $0x90] sm:$0xff] }
 0x895   : > { %v884_v13 = vpop.permute.xlu1 %883 }
 0x896   : > { %v887_v14 = vsel %vm886_vm9, 0.0, %v884_v13  ;;  %v1853_v18 = vmul.f32 %v5021_v17, %v5021_v17 }
 0x897   : > { %v889_v15 = vsel %vm888_vm10, %v887_v14, 0.0 }
 0x898   : > { %1283 = vrot.lane.b32.xlu1 %v889_v15, %s5537_s6  ;;  %893 = vrot.lane.b32.xlu0 %v889_v15, %s4749_s29  ;;  %v1854_v19 = vsel %vm1846_vm8, %v1853_v18, 0.0  ;;  %s4055_s6 = sshll.u32 %s5217_s12, 2 }
 0x899   : > { %4333 = vmatpush3.msk.msra.mxu1 %vm492_vm5, %v889_v15 }
 0x89a   : > { %4335 = vmatmul.mubr.msk.f32.vlgmr.msra.gmra.mxu1 %vm488_vm7, %v890_v16  ;;  %4342 = vmatprep.subr.mxu1 %v4747_v1 }
 0x89b   : > { %4344 = vmatprep.mubr.msk.f32.mxu1 %vm4748_vm1, %v4747_v1 }
 0x89c   : > { %1441 = vrot.lane.b32.xlu1 %v889_v15, %s4757_s7  ;;  %1046 = vrot.lane.b32.xlu0 %v889_v15, %s4758_s8 }
 0x8a0   : > { %1125 = vrot.lane.b32.xlu0 %v889_v15, %s4759_s9 }
 0x8a4   : > { %1204 = vrot.lane.b32.xlu0 %v889_v15, %s5541_s10  ;;  %s5229_s10 = scalar_lea.vmem [#allocation2], %s4055_s6 }
 0x8a8   : > { %1362 = vrot.lane.b32.xlu0 %v889_v15, %s5538_s11  ;;  %s4141_s11 = sshll.u32 %s4814_s19, 6 }
 0x8ac   : > { %1520 = vrot.lane.b32.xlu0 %v889_v15, %s4752_s27 }
 0x8b0   : > { %1599 = vrot.lane.b32.xlu0 %v889_v15, %s5539_s14 }
 0x8b4   : > { %1678 = vrot.lane.b32.xlu0 %v889_v15, %s5540_s20 }
 0x8b8   : > { %1758 = vperm.xlu0 %4618, %v238_v20  }
 0x8c0   : > { %1855 = vadd.xlane.f32.xlu1 %v1854_v19 }
 0x90a   : > { %v894_v23 = vpop.permute.xlu0 %893  ;;  %v1284_v27 = vpop.permute.xlu1 %1283 }
 0x90b   : > { %4328 = vmatpush3.msk.msra.mxu0 %vm492_vm5, %v894_v23 }
 0x90c   : > { %4337 = vmatprep.subr.mxu0 %v4747_v1  ;;  %4330 = vmatmul.mubr.msk.f32.vlgmr.msra.gmra.mxu0 %vm488_vm7, %v891_v22 }
 0x90d   : > { %4339 = vmatprep.mubr.msk.f32.mxu0 %vm4748_vm1, %v4747_v1 }
 0x90e   : > { %v1047_v25 = vpop.permute.xlu0 %1046  ;;  %v1442_v32 = vpop.permute.xlu1 %1441 }
 0x90f   : > { %4338 = vmatpush3.msk.msra.mxu0 %vm492_vm5, %v1047_v25 }
 0x910   : > { %4347 = vmatprep.subr.mxu0 %v4747_v1  ;;  %4340 = vmatmul.mubr.msk.f32.vlgmr.msra.gmra.mxu0 %vm488_vm7, %v1045_v24 }
 0x911   : > { %4349 = vmatprep.mubr.msk.f32.mxu0 %vm4748_vm1, %v4747_v1 }
 0x912   : > { %v1126_v28 = vpop.permute.xlu0 %1125 }
 0x913   : > { %4343 = vmatpush3.msk.msra.mxu1 %vm492_vm5, %v1126_v28 }
 0x914   : > { %4345 = vmatmul.mubr.msk.f32.vlgmr.msra.gmra.mxu1 %vm488_vm7, %v1124_v26  ;;  %4352 = vmatprep.subr.mxu1 %v4747_v1 }
 0x915   : > { %4353 = vmatpush3.msk.msra.mxu1 %vm492_vm5, %v1284_v27  ;;  %4354 = vmatprep.mubr.msk.f32.mxu1 %vm4748_vm1, %v4747_v1 }
 0x916   : > { %v1205_v30 = vpop.permute.xlu0 %1204  ;;  %4362 = vmatprep.subr.mxu1 %v4747_v1 }
 0x917   : > { %4348 = vmatpush3.msk.msra.mxu0 %vm492_vm5, %v1205_v30 }
 0x918   : > { %4355 = vmatmul.mubr.msk.f32.vlgmr.msra.gmra.mxu1 %vm488_vm7, %v1282_v29  ;;  %4357 = vmatprep.subr.mxu0 %v4747_v1 }
 0x919   : > { %4363 = vmatpush3.msk.msra.mxu1 %vm492_vm5, %v1442_v32  ;;  %4350 = vmatmul.mubr.msk.f32.vlgmr.msra.gmra.mxu0 %vm488_vm7, %v1203_v31 }
 0x91a   : > { %v1363_v34 = vpop.permute.xlu0 %1362  ;;  %4359 = vmatprep.mubr.msk.f32.mxu0 %vm4748_vm1, %v4747_v1  ;;  %4364 = vmatprep.mubr.msk.f32.mxu1 %vm4748_vm1, %v4747_v1 }
 0x91b   : > { %4358 = vmatpush3.msk.msra.mxu0 %vm492_vm5, %v1363_v34  ;;  %4372 = vmatprep.subr.mxu1 %v4747_v1 }
 0x91c   : > { %4367 = vmatprep.subr.mxu0 %v4747_v1  ;;  %4365 = vmatmul.mubr.msk.f32.vlgmr.msra.gmra.mxu1 %vm488_vm7, %v1440_v33 }
 0x91d   : > { %4360 = vmatmul.mubr.msk.f32.vlgmr.msra.gmra.mxu0 %vm488_vm7, %v1361_v35  ;;  %4374 = vmatprep.mubr.msk.f32.mxu1 %vm4748_vm1, %v4747_v1 }
 0x91e   : > { %v1521_v36 = vpop.permute.xlu0 %1520  ;;  %4369 = vmatprep.mubr.msk.f32.mxu0 %vm4748_vm1, %v4747_v1 }
 0x91f   : > { %4368 = vmatpush3.msk.msra.mxu0 %vm492_vm5, %v1521_v36 }
 0x920   : > { %4377 = vmatprep.subr.mxu0 %v4747_v1 }
 0x921   : > { %4370 = vmatmul.mubr.msk.f32.vlgmr.msra.gmra.mxu0 %vm488_vm7, %v1519_v37 }
 0x922   : > { %v1600_v39 = vpop.permute.xlu0 %1599  ;;  %4379 = vmatprep.mubr.msk.f32.mxu0 %vm4748_vm1, %v4747_v1 }
 0x923   : > { %4373 = vmatpush3.msk.msra.mxu1 %vm492_vm5, %v1600_v39 }
 0x924   : > { %4375 = vmatmul.mubr.msk.f32.vlgmr.msra.gmra.mxu1 %vm488_vm7, %v1598_v38  ;;  %4382 = vmatprep.subr.mxu1 %v4747_v1 }
 0x925   : > { %4383 = vmatpush3.msk.msra.mxu1 %vm248_vm0, %v4845_v0  ;;  %4398 = vmatprep.mubr.msk.f32.mxu1 %vm4748_vm1, %v4747_v1  ;;  %v231_v0 = vld [vmem:[%s5532_s1 + $0x80] sm:$0xff] }
 0x926   : > { %v1679_v41 = vpop.permute.xlu0 %1678  ;;  %4384 = vmatprep.subr.mxu1 %v4747_v1 }
 0x927   : > { %4378 = vmatpush3.msk.msra.mxu0 %vm492_vm5, %v1679_v41  ;;  %4385 = vmatpush3.msra.mxu1 %v4851_v2  ;;  %v229_v2 = vld [vmem:[%s5532_s1 + $0x70] sm:$0xff] }
 0x928   : > { %4380 = vmatmul.mubr.msk.f32.vlgmr.msra.gmra.mxu0 %vm488_vm7, %v1677_v40  ;;  %4401 = vmatprep.subr.mxu0 %v4747_v1  ;;  %v1873_v40 = vsub.s32 3, %v4987_v56 }
 0x929   : > { %4402 = vmatpush3.msra.mxu0 %v232_v42  ;;  %4409 = vmatprep.mubr.msk.f32.mxu0 %vm4748_vm1, %v4747_v1 }
 0x92a   : > { %4403 = vmatprep.subr.mxu0 %v4747_v1  ;;  %4386 = vmatprep.subr.mxu1 %v4747_v1  ;;  %v1874_v41 = vrot.slane %v4993_v58, %v1873_v40 }
 0x92b   : > { %4404 = vmatpush3.msra.mxu0 %v231_v0  ;;  %4387 = vmatpush3.msra.mxu1 %v4865_v3 }
 0x92c   : > { %4405 = vmatprep.subr.mxu0 %v4747_v1  ;;  %4388 = vmatprep.subr.mxu1 %v4747_v1 }
 0x92d   : > { %4406 = vmatpush3.msra.mxu0 %v230_v43  ;;  %4389 = vmatpush3.msra.mxu1 %v4886_v6 }
 0x92e   : > { %4407 = vmatprep.subr.mxu0 %v4747_v1  ;;  %4390 = vmatprep.subr.mxu1 %v4747_v1 }
 0x92f   : > { %4408 = vmatpush3.msra.mxu0 %v229_v2  ;;  %4391 = vmatpush3.msra.mxu1 %v4901_v9  ;;  %v1863_v9 = vsub.s32 1, %v4987_v56 }
 0x930   : > { %4412 = vmatprep.subr.mxu0 %v4747_v1  ;;  %4392 = vmatprep.subr.mxu1 %v4747_v1 }
 0x931   : > { %4393 = vmatpush3.msra.mxu1 %v4909_v10  ;;  %v1864_v10 = vrot.slane %v4993_v58, %v1863_v9 }
 0x932   : > { %4394 = vmatprep.subr.mxu1 %v4747_v1 }
 0x933   : > { %4395 = vmatpush3.msra.mxu1 %v4917_v11  ;;  %v1759_v31 = vpop.permute.xlu0 %1758 }
 0x934   : > { %4396 = vmatprep.subr.mxu1 %v4747_v1 }
 0x935   : > { %4397 = vmatpush3.msra.mxu1 %v4924_v12  ;;  %v1869_v12 = vrot.slane %v4993_v58, %v1868_v45 }
 0x936   : > { %4423 = vmatprep.subr.mxu1 %v4747_v1 }
 0x949   : > { %v1856_v3 = vpop.xlane.xlu1 %1855 }
 0x94a   : > { %v1857_v6 = vmul.f32 0.03125, %v1856_v3 }
 0x94c   : > { %v1858_v44 = vadd.f32 1e-05, %v1857_v6 }
 0x94e   : > { %4627 = vrsqrt.f32 %v1858_v44 }
 0x95a   : > { %v1041_v46 = vpop.f32.mrf.mxu1 }
 0x95b   : > { %v4628_v11 = vpop.eup %4627 }
 0x95c   : > { %v1860_v47 = vmul.f32 %v4628_v11, %v5021_v17  ;;  %v4336_v48 = vpop.f32.mrf.mxu1 }
 0x95e   : > { %v1865_v49 = vmul.f32 %v1864_v10, %v1860_v47 }
 0x960   : > { %v1870_v50 = vadd.f32 %v1869_v12, %v1865_v49 }
 0x962   : > { %4410 = vmatmul.mubr.msk.f32.vlgmr.msra.gmra.mxu0 %vm322_vm3, %v1870_v50 }
 0x963   : > { %4420 = vmatprep.mubr.msk.f32.mxu0 %vm4748_vm1, %v4747_v1  ;;  %4413 = vmatpush3.msra.mxu0 %v236_v55 }
 0x964   : > { %4414 = vmatprep.subr.mxu0 %v4747_v1 }
 0x965   : > { %4415 = vmatpush3.msra.mxu0 %v235_v61 }
 0x966   : > { %4416 = vmatprep.subr.mxu0 %v4747_v1 }
 0x967   : > { %4417 = vmatpush3.msra.mxu0 %v234_v63 }
 0x968   : > { %4418 = vmatprep.subr.mxu0 %v4747_v1 }
 0x969   : > { %4419 = vmatpush3.msra.mxu0 %v233_v4 }
 0x96a   : > { %4434 = vmatprep.subr.mxu0 %v4747_v1 }
 0x9cc   : > { %v966_v51 = vpop.f32.mrf.mxu0 }
 0x9cd   : > { %v1042_v53 = vadd.f32 %v1041_v46, %v966_v51 }
 0x9ce   : > { %v4331_v52 = vpop.f32.mrf.mxu0 }
 0x9d0   : > { %v1119_v54 = vpop.f32.mrf.mxu0 }
 0x9d1   : > { %v1123_v59 = vadd.f32 %v1119_v54, %v1042_v53 }
 0x9d2   : > { %v4341_v60 = vpop.f32.mrf.mxu0 }
 0x9d4   : > { %v1198_v62 = vpop.f32.mrf.mxu1 }
 0x9d5   : > { %v1202_v5 = vadd.f32 %v1198_v62, %v1123_v59  ;;  %v4765_v62 = vmov -1.0  }
 0x9d6   : > { %v4346_v8 = vpop.f32.mrf.mxu1 }
 0x9d8   : > { %v1356_v13 = vpop.f32.mrf.mxu1 }
 0x9d9   : > { %v1277_v14 = vpop.f32.mrf.mxu0 }
 0x9da   : > { %v1281_v15 = vadd.f32 %v1277_v14, %v1202_v5  ;;  %v4356_v16 = vpop.f32.mrf.mxu1 }
 0x9db   : > { %v4351_v7 = vpop.f32.mrf.mxu0  ;;  %v5185_v16 = vld [vmem:[%s5532_s1 + $0x130] sm:$0x7f] }
 0x9dc   : > { %v1360_v17 = vadd.f32 %v1356_v13, %v1281_v15  ;;  %v1514_v18 = vpop.f32.mrf.mxu1  ;;  %v5190_v7 = vld [vmem:[%s5532_s1 + $0x128] sm:$0xff] }
 0x9dd   : > { %v1435_v19 = vpop.f32.mrf.mxu0 }
 0x9de   : > { %v1439_v20 = vadd.f32 %v1435_v19, %v1360_v17  ;;  %v4366_v21 = vpop.f32.mrf.mxu1  ;;  %v5198_v17 = vld [vmem:[%s5532_s1 + $0x120] sm:$0xff] }
 0x9df   : > { %v4361_v22 = vpop.f32.mrf.mxu0  ;;  %v1977_v21 = vsub.s32 4, %v4987_v56 }
 0x9e0   : > { %v1518_v23 = vadd.f32 %v1514_v18, %v1439_v20  ;;  %v5207_v20 = vld [vmem:[%s5532_s1 + $0x118] sm:$0xff]  ;;  %v2066_v22 = vld [vmem:[%s5532_s1 + $0x140] sm:$0xff] }
 0x9e1   : > { %v1593_v24 = vpop.f32.mrf.mxu0 }
 0x9e2   : > { %v1597_v25 = vadd.f32 %v1593_v24, %v1518_v23  ;;  %v1978_v23 = vrot.slane %v4993_v58, %v1977_v21  ;;  %v2065_v58 = vld [vmem:[%s5532_s1 + $0x138] sm:$0xff] }
 0x9e3   : > { %v4371_v26 = vpop.f32.mrf.mxu0 }
 0x9e4   : > { %v1672_v27 = vpop.f32.mrf.mxu1 }
 0x9e5   : > { %v1676_v29 = vadd.f32 %v1672_v27, %v1597_v25 }
 0x9e6   : > { %v4376_v28 = vpop.f32.mrf.mxu1 }
 0x9e8   : > { %v1751_v30 = vpop.f32.mrf.mxu0 }
 0x9e9   : > { %v1755_v32 = vadd.f32 %v1751_v30, %v1676_v29 }
 0x9ea   : > { %v4381_v33 = vpop.f32.mrf.mxu0 }
 0x9eb   : > { %v1761_v34 = vadd.f32 %v1759_v31, %v1755_v32 }
 0x9ed   : > { %v1763_v35 = vmin.f32 %v1761_v34, 0.0  ;;  %vm1762_vm11 = vcmp.gt.f32.partialorder %v1761_v34, 0.0 }
 0x9ef   : > { %v1764_v36 = vmul.f32 1.442695, %v1763_v35 }
 0x9f1   : > { %4629 = vpow2.f32 %v1764_v36 }
 0x9fe   : > { %v4630_v37 = vpop.eup %4629 }
 0x9ff   : > { %v4094_v38 = vadd.f32 -1.0, %v4630_v37 }
 0xa01   : > { %v1767_v39 = vsel %vm1762_vm11, %v1761_v34, %v4094_v38 }
 0xa02   : > { %1769 = vrot.lane.b32.xlu0 %v1767_v39, %s4749_s29 }
 0xa22   : > { %v1944_v42 = vpop.f32.mrf.mxu0 }
 0xa23   : > { %v1945_v0 = vadd.f32 %v1944_v42, %v1874_v41 }
 0xa24   : > { %v4411_v43 = vpop.f32.mrf.mxu0 }
 0xa25   : > { %v1949_v2 = vmul.f32 0.70710677, %v1945_v0  ;;  %v1948_v5 = vmul.f32 0.5, %v1945_v0 }
 0xa27   : > { %v1952_v3 = vand.u32 2147483647, %v1949_v2  ;;  %vm1950_vm12 = vcmp.ge.f32.partialorder %v1949_v2, 0.0 }
 0xa28   : > { %v1951_v63 = vsel %vm1950_vm12, 1.0, %v4765_v62 }
 0xa29   : > { %v1953_v6 = vmul.f32 0.3275911, %v1952_v3  ;;  %v1966_v10 = vsub.f32 0.0, %v1952_v3 }
 0xa2b   : > { %v1954_v44 = vadd.f32 1.0, %v1953_v6  ;;  %v1967_v46 = vmul.f32 %v1966_v10, %v1952_v3 }
 0xa2d   : > { %4631 = vrcp.f32 %v1954_v44  ;;  %v1968_v12 = vmul.f32 1.442695, %v1967_v46 }
 0xa2f   : > { %4633 = vpow2.f32 %v1968_v12 }
 0xa3a   : > { %v4632_v11 = vpop.eup %4631 }
 0xa3b   : > { %v1957_v47 = vmul.f32 1.0614054, %v4632_v11 }
 0xa3c   : > { %v4634_v59 = vpop.eup %4633 }
 0xa3d   : > { %v1958_v48 = vadd.f32 -1.4531521, %v1957_v47 }
 0xa3f   : > { %v1959_v49 = vmul.f32 %v4632_v11, %v1958_v48 }
 0xa41   : > { %v1960_v50 = vadd.f32 1.4214138, %v1959_v49 }
 0xa43   : > { %v1961_v51 = vmul.f32 %v4632_v11, %v1960_v50 }
 0xa45   : > { %v1962_v52 = vadd.f32 -0.28449672, %v1961_v51 }
 0xa47   : > { %v1963_v53 = vmul.f32 %v4632_v11, %v1962_v52 }
 0xa49   : > { %v1964_v54 = vadd.f32 0.2548296, %v1963_v53 }
 0xa4b   : > { %v1965_v55 = vmul.f32 %v4632_v11, %v1964_v54 }
 0xa4d   : > { %v1970_v60 = vmul.f32 %v4634_v59, %v1965_v55 }
 0xa4f   : > { %v1971_v61 = vsub.f32 1.0, %v1970_v60 }
 0xa51   : > { %v1972_v4 = vmul.f32 %v1971_v61, %v1951_v63  ;;  %v2067_v63 = vld [vmem:[%s5532_s1 + $0x148] sm:$0xff] }
 0xa53   : > { %v1973_v8 = vadd.f32 1.0, %v1972_v4  ;;  %v2068_v4 = vld [vmem:[%s5532_s1 + $0x150] sm:$0xff] }
 0xa55   : > { %v1974_v13 = vmul.f32 %v1973_v8, %v1948_v5 }
 0xa57   : > { %4421 = vmatmul.mubr.msk.f32.vlgmr.msra.gmra.mxu0 %vm322_vm3, %v1974_v13 }
 0xa58   : > { %4438 = vmatprep.mubr.msk.f32.mxu0 %vm4748_vm1, %v4747_v1  ;;  %4435 = vmatpush3.msra.mxu0 %v2066_v22 }
 0xa59   : > { %4436 = vmatprep.subr.mxu0 %v4747_v1 }
 0xa5a   : > { %4437 = vmatpush3.msra.mxu0 %v2065_v58  ;;  %v2877_v58 = vld [vmem:[%s5532_s1 + $0x198] sm:$0xf] }
 0xa5b   : > { %4441 = vmatprep.subr.mxu0 %v4747_v1 }
 0xa74   : > { %v1770_v14 = vpop.permute.xlu0 %1769 }
 0xa75   : > { %v1772_v15 = vmax.f32 %v1767_v39, %v1770_v14 }
 0xa77   : > { %4399 = vmatmul.mubr.msk.f32.vlgmr.msra.gmra.mxu1 %vm244_vm2, %v1772_v15 }
 0xa78   : > { %4431 = vmatprep.mubr.msk.f32.mxu1 %vm4748_vm1, %v4747_v1  ;;  %4424 = vmatpush3.msk.msra.mxu1 %vm248_vm0, %v5185_v16 }
 0xa79   : > { %4425 = vmatprep.subr.mxu1 %v4747_v1 }
 0xa7a   : > { %4426 = vmatpush3.msra.mxu1 %v5190_v7 }
 0xa7b   : > { %4427 = vmatprep.subr.mxu1 %v4747_v1 }
 0xa7c   : > { %4428 = vmatpush3.msra.mxu1 %v5198_v17 }
 0xa7d   : > { %4429 = vmatprep.subr.mxu1 %v4747_v1 }
 0xa7e   : > { %4430 = vmatpush3.msra.mxu1 %v5207_v20 }
 0xa7f   : > { %4446 = vmatprep.subr.mxu1 %v4747_v1 }
 0xb17   : > { %v2048_v18 = vpop.f32.mrf.mxu0 }
 0xb18   : > { %v2049_v24 = vadd.f32 %v2048_v18, %v1978_v23  ;;  %v2722_v18 = vld [vmem:[%s5532_s1 + $0x188] sm:$0xf]  ;;  %v2956_v23 = vld [vmem:[%s5532_s1 + $0x1a0] sm:$0xf] }
 0xb19   : > { %v4422_v19 = vpop.f32.mrf.mxu0 }
 0xb37   : > { %v5223_v25 = vpop.f32.mrf.mxu1 }
 0xb38   : > { %v2052_v26 = vadd.f32 %v2049_v24, %v5223_v25 }
 0xb39   : > { %v4400_v27 = vpop.f32.mrf.mxu1 }
 0xb3a   : > { %2078 = vrot.lane.b32.xlu0 %v2052_v26, %s4749_s29  ;;  %2053 = vst.msk [vmem:[%s5229_s10] sm:$0xf] %vm1846_vm8, %v2052_v26 }
 0xbac   : > { %v2079_v28 = vpop.permute.xlu0 %2078 }
 0xbad   : > { %v2081_v29 = vmax.f32 %v2052_v26, %v2079_v28  ;;  %v3114_v28 = vld [vmem:[%s5532_s1 + $0x1b0] sm:$0xf] }
 0xbaf   : > { %4432 = vmatmul.mubr.msk.f32.vlgmr.msra.gmra.mxu1 %vm2082_vm13, %v2081_v29 }
 0xbb0   : > { %4448 = vmatprep.mubr.msk.f32.mxu1 %vm4748_vm1, %v4747_v1 }
 0xc6f   : > { %v5240_v30 = vpop.f32.mrf.mxu1 }
 0xc70   : > { %4439 = vmatmul.mubr.msk.f32.vlgmr.msra.gmra.mxu0 %vm2159_vm14, %v5240_v30 }
 0xc71   : > { %v4433_v31 = vpop.f32.mrf.mxu1  ;;  %4443 = vmatprep.mubr.msk.f32.mxu0 %vm4748_vm1, %v4747_v1 }
 0xd30   : > { %v2229_v32 = vpop.f32.mrf.mxu0 }
 0xd31   : > { %2234 = vrot.lane.b32.xlu0 %v2229_v32, %s4750_s22  ;;  %s5544_s22 = smov 124  }
 0xd32   : > { %v4440_v33 = vpop.f32.mrf.mxu0 }
 0xd33   : > { %v3035_v33 = vld [vmem:[%s5532_s1 + $0x1a8] sm:$0xf] }
 0xd35   : > { %2400 = vrot.lane.b32.xlu0 %v2229_v32, %s4753_s28  ;;  %s3920_s28 = sshll.u32 %s5229_s10, 4  ;;  %s3921_s28 = int_to_ptr.vmem [resolvable:$true] %s3920_s28 }
 0xd39   : > { %2398 = vrot.lane.b32.xlu0 %v2229_v32, %s4752_s27 }
 0xda3   : > { %v2235_v34 = vpop.permute.xlu0 %2234 }
 0xda4   : > { %4442 = vmatpush3.xpose.msk.msra.mxu0 %vm399_vm4, %v2235_v34 }
 0xda5   : > { %4451 = vmatprep.subr.mxu0 %v4747_v1 }
 0xda7   : > { %4444 = vmatmul.mubr.msk.f32.vlgmr.msra.gmra.mxu0 %vm399_vm4, %v2229_v32  ;;  %v2401_v35 = vpop.permute.xlu0 %2400 }
 0xda8   : > { %4452 = vmatpush3.xpose.msk.msra.mxu0 %vm399_vm4, %v2401_v35  ;;  %4453 = vmatprep.mubr.msk.f32.mxu0 %vm4748_vm1, %v4747_v1  ;;  %v3430_v35 = vld [vmem:[%s5532_s1 + $0x1d0] sm:$0xf] }
 0xda9   : > { %4461 = vmatprep.subr.mxu0 %v4747_v1 }
 0xdab   : > { %v2399_v36 = vpop.permute.xlu0 %2398 }
 0xdac   : > { %4454 = vmatmul.mubr.msk.f32.vlgmr.msra.gmra.mxu0 %vm399_vm4, %v2399_v36  ;;  %v3193_v36 = vld [vmem:[%s5532_s1 + $0x1b8] sm:$0xf] }
 0xdad   : > { %4463 = vmatprep.mubr.msk.f32.mxu0 %vm4748_vm1, %v4747_v1  ;;  %4462 = vmatpush3.msra.mxu0 %v2068_v4 }
 0xdae   : > { %4471 = vmatprep.subr.mxu0 %v4747_v1 }
 0xe67   : > { %v2306_v37 = vpop.f32.mrf.mxu0 }
 0xe68   : > { %v2310_v38 = vsel %vm474_vm6, %v2306_v37, -inf }
 0xe69   : > { %2311 = vmax.xlane.f32.xlu1 %v2310_v38  ;;  %v4445_v39 = vpop.f32.mrf.mxu0  ;;  %v3351_v38 = vld [vmem:[%s5532_s1 + $0x1c8] sm:$0xf] }
 0xe6c   : > { %v2472_v41 = vpop.f32.mrf.mxu0 }
 0xe6d   : > { %v2476_v42 = vsel %vm474_vm6, %v2472_v41, -inf }
 0xe6e   : > { %2477 = vmax.xlane.f32.xlu0 %v2476_v42  ;;  %v4455_v0 = vpop.f32.mrf.mxu0  ;;  %v5400_v42 = vld [vmem:[%s5532_s1 + $0x1e0] sm:$0x1f] }
 0xe7a   : > { %2321 = vrot.lane.b32.xlu1 %v2229_v32, %s4751_s23  ;;  %s5545_s23 = smov 119  }
 0xef2   : > { %v2312_v43 = vpop.xlane.xlu1 %2311 }
 0xef3   : > { %v2313_v2 = vsub.f32 %v2306_v37, %v2312_v43 }
 0xef5   : > { %v2314_v3 = vmul.f32 1.442695, %v2313_v2  ;;  %v2714_v2 = vrot.slane %v5400_v42, %v880_v57 }
 0xef6   : > { %v2322_v6 = vpop.permute.xlu1 %2321 }
 0xef7   : > { %4635 = vpow2.f32 %v2314_v3  ;;  %4447 = vmatpush3.msk.msra.mxu1 %vm492_vm5, %v2322_v6  ;;  %v2478_v44 = vpop.xlane.xlu0 %2477 }
 0xef8   : > { %v2479_v10 = vsub.f32 %v2472_v41, %v2478_v44  ;;  %4456 = vmatprep.subr.mxu1 %v4747_v1 }
 0xefa   : > { %v2480_v46 = vmul.f32 1.442695, %v2479_v10 }
 0xefc   : > { %4637 = vpow2.f32 %v2480_v46 }
 0xf04   : > { %v4636_v11 = vpop.eup %4635 }
 0xf05   : > { %v2316_v47 = vsel %vm474_vm6, %v4636_v11, 0.0 }
 0xf06   : > { %2317 = vadd.xlane.f32.xlu1 %v2316_v47 }
 0xf09   : > { %v4638_v12 = vpop.eup %4637 }
 0xf0a   : > { %v2482_v48 = vsel %vm474_vm6, %v4638_v12, 0.0 }
 0xf0b   : > { %2483 = vadd.xlane.f32.xlu1 %v2482_v48 }
 0xf1c   : > { %2487 = vrot.lane.b32.xlu1 %v2229_v32, %s4754_s30  ;;  %v3272_v32 = vld [vmem:[%s5532_s1 + $0x1c0] sm:$0xf]  ;;  %s4655_s30 = scalar_lea.vmem %s3921_s28, 64 }
 0xf1d   : > { %p4656_p11 = scmp.ne.s32.totalorder %s3921_s28, %s4655_s30 }
 0xf1f   : > { %p4657_p12 = pnand %p4656_p11, %p4831_p5 }
 0xf20   : > { %2716 = vrot.lane.b32.xlu1 %v2052_v26, %s4755_s13  ;;  %s5546_s13 = smov 123   ;;  %v2723_v26 = vld [vmem:[%s5532_s1 + $0x190] sm:$0xf] }
 0xf21   : > { %p4658_p13 = pneg %p4657_p12 }
 0xf8f   : > { %v2318_v49 = vpop.xlane.xlu1 %2317 }
 0xf90   : > { %4639 = vrcp.f32 %v2318_v49 }
 0xf94   : > { %v2484_v50 = vpop.xlane.xlu1 %2483 }
 0xf95   : > { %4641 = vrcp.f32 %v2484_v50 }
 0xf98   : > { %v2488_v51 = vpop.permute.xlu1 %2487 }
 0xf9c   : > { %v2717_v52 = vpop.permute.xlu1 %2716 }
 0xf9d   : > { %v4640_v53 = vpop.eup %4639  ;;  %v2719_v54 = vsel %vm886_vm9, 0.0, %v2717_v52 }
 0xf9e   : > { %v2721_v55 = vsel %vm2720_vm15, %v2719_v54, 0.0  ;;  %v2320_v59 = vmul.f32 %v4640_v53, %v4636_v11 }
 0xf9f   : > { %2878 = vrot.lane.b32.xlu1 %v2721_v55, %s4758_s8  ;;  %2725 = vrot.lane.b32.xlu0 %v2721_v55, %s4749_s29  ;;  %s5548_s8 = smov 118  }
 0xfa0   : > { %4449 = vmatmul.mubr.msk.f32.vlgmr.msra.gmra.mxu1 %vm488_vm7, %v2320_v59 }
 0xfa1   : > { %4457 = vmatpush3.msk.msra.mxu1 %vm492_vm5, %v2488_v51  ;;  %4458 = vmatprep.mubr.msk.f32.mxu1 %vm4748_vm1, %v4747_v1 }
 0xfa2   : > { %v4642_v60 = vpop.eup %4641  ;;  %4466 = vmatprep.subr.mxu1 %v4747_v1 }
 0xfa3   : > { %2957 = vrot.lane.b32.xlu1 %v2721_v55, %s4759_s9  ;;  %3273 = vrot.lane.b32.xlu0 %v2721_v55, %s4757_s7  ;;  %v2486_v61 = vmul.f32 %v4642_v60, %v4638_v12  ;;  %s5547_s7 = smov 122  }
 0xfa5   : > { %4459 = vmatmul.mubr.msk.f32.vlgmr.msra.gmra.mxu1 %vm488_vm7, %v2486_v61 }
 0xfa6   : > { %4468 = vmatprep.mubr.msk.f32.mxu1 %vm4748_vm1, %v4747_v1  ;;  %4467 = vmatpush3.msra.mxu1 %v2067_v63 }
 0xfa7   : > { %3036 = vrot.lane.b32.xlu1 %v2721_v55, %s5544_s22  ;;  %3431 = vrot.lane.b32.xlu0 %v2721_v55, %s5545_s23  ;;  %s5464_s23 = scalar_lea.hbm %s5533_s2, %s4141_s11 }
 0xfa8   : > { %4476 = vmatprep.subr.mxu1 %v4747_v1 }
 0xfab   : > { %3115 = vrot.lane.b32.xlu1 %v2721_v55, %s5546_s13  ;;  %s4766_s13 = smov [#allocation2]  }
 0xfaf   : > { %3194 = vrot.lane.b32.xlu1 %v2721_v55, %s5547_s7  ;;  %s4659_s7 = sshll.u32 %s4766_s13, 4  ;;  %s4660_s7 = int_to_ptr.vmem [resolvable:$false] %s4659_s7 }
 0xfb0   : > { %p4662_p0 = scmp.lt.s32.totalorder %s3921_s28, %s4660_s7 }
 0xfb3   : > { %3352 = vrot.lane.b32.xlu1 %v2721_v55, %s4752_s27 }
 0xfb7   : > { %3510 = vrot.lane.b32.xlu1 %v2721_v55, %s5548_s8  ;;  %s4661_s8 = scalar_lea.vmem %s4660_s7, 128 }
 0xfb8   : > { %p4663_p1 = scmp.lt.s32.totalorder %s4661_s8, %s4655_s30 }
 0xfba   : > { %p4664_p2 = por %p4663_p1, %p4662_p0 }
 0xfbc   : > { %p4665_p3 = pnand %p4664_p2, %p4658_p13 }
0x1011   : > { %v2879_v5 = vpop.permute.xlu1 %2878  ;;  %v2726_v19 = vpop.permute.xlu0 %2725 }
0x1015   : > { %v2958_v8 = vpop.permute.xlu1 %2957  ;;  %v3274_v29 = vpop.permute.xlu0 %3273 }
0x1019   : > { %v3037_v14 = vpop.permute.xlu1 %3036  ;;  %v3432_v34 = vpop.permute.xlu0 %3431 }
0x101d   : > { %v3116_v27 = vpop.permute.xlu1 %3115 }
0x1021   : > { %v3195_v31 = vpop.permute.xlu1 %3194 }
0x1025   : > { %v3353_v37 = vpop.permute.xlu1 %3352 }
0x1029   : > { %v3511_v39 = vpop.permute.xlu1 %3510 }
0x1060   : > { %v2394_v13 = vpop.f32.mrf.mxu1 }
0x1061   : > { %4469 = vmatmul.mubr.msk.f32.vlgmr.msra.gmra.mxu1 %vm399_vm4, %v2394_v13 }
0x1062   : > { %4477 = vmatpush3.msk.msra.mxu1 %vm492_vm5, %v2721_v55  ;;  %v4450_v15 = vpop.f32.mrf.mxu1  ;;  %4478 = vmatprep.mubr.msk.f32.mxu1 %vm4748_vm1, %v4747_v1 }
0x1063   : > { %4486 = vmatprep.subr.mxu1 %v4747_v1 }
0x1065   : > { %v2560_v22 = vpop.f32.mrf.mxu1  ;;  %4479 = vmatmul.mubr.msk.f32.vlgmr.msra.gmra.mxu1 %vm488_vm7, %v2722_v18 }
0x1066   : > { %4487 = vmatpush3.msk.msra.mxu1 %vm492_vm5, %v2958_v8  ;;  %4464 = vmatmul.mubr.msk.f32.vlgmr.msra.gmra.mxu0 %vm399_vm4, %v2560_v22 }
0x1067   : > { %4472 = vmatpush3.msk.msra.mxu0 %vm492_vm5, %v2726_v19  ;;  %v4460_v24 = vpop.f32.mrf.mxu1  ;;  %4488 = vmatprep.mubr.msk.f32.mxu1 %vm4748_vm1, %v4747_v1 }
0x1068   : > { %4496 = vmatprep.subr.mxu1 %v4747_v1  ;;  %4473 = vmatprep.mubr.msk.f32.mxu0 %vm4748_vm1, %v4747_v1 }
0x1069   : > { %4481 = vmatprep.subr.mxu0 %v4747_v1  ;;  %4489 = vmatmul.mubr.msk.f32.vlgmr.msra.gmra.mxu1 %vm488_vm7, %v2956_v23 }
0x106a   : > { %4497 = vmatpush3.msk.msra.mxu1 %vm492_vm5, %v3116_v27  ;;  %4474 = vmatmul.mubr.msk.f32.vlgmr.msra.gmra.mxu0 %vm488_vm7, %v2723_v26  ;;  %v2076_v27 = vld [vmem:[%s5532_s1 + $0x1e8] sm:$0xf] }
0x106b   : > { %4482 = vmatpush3.msk.msra.mxu0 %vm492_vm5, %v2879_v5  ;;  %4498 = vmatprep.mubr.msk.f32.mxu1 %vm4748_vm1, %v4747_v1 }
0x106c   : > { %4506 = vmatprep.subr.mxu1 %v4747_v1  ;;  %4483 = vmatprep.mubr.msk.f32.mxu0 %vm4748_vm1, %v4747_v1 }
0x106d   : > { %4491 = vmatprep.subr.mxu0 %v4747_v1  ;;  %4499 = vmatmul.mubr.msk.f32.vlgmr.msra.gmra.mxu1 %vm488_vm7, %v3114_v28  ;;  %v2054_v28 = vmul.f32 %v5223_v25, %v5223_v25  ;;  %v2070_v25 = vld [vmem:[%s5532_s1 + $0x160] sm:$0xff] }
0x106e   : > { %4507 = vmatpush3.msk.msra.mxu1 %vm492_vm5, %v3274_v29  ;;  %4484 = vmatmul.mubr.msk.f32.vlgmr.msra.gmra.mxu0 %vm488_vm7, %v2877_v58 }
0x106f   : > { %4492 = vmatpush3.msk.msra.mxu0 %vm492_vm5, %v3037_v14  ;;  %4508 = vmatprep.mubr.msk.f32.mxu1 %vm4748_vm1, %v4747_v1  ;;  %v2055_v29 = vsel %vm1846_vm8, %v2054_v28, 0.0 }
0x1070   : > { %4516 = vmatprep.subr.mxu1 %v4747_v1  ;;  %4493 = vmatprep.mubr.msk.f32.mxu0 %vm4748_vm1, %v4747_v1 }
0x1071   : > { %4501 = vmatprep.subr.mxu0 %v4747_v1  ;;  %4509 = vmatmul.mubr.msk.f32.vlgmr.msra.gmra.mxu1 %vm488_vm7, %v3272_v32 }
0x1072   : > { %4517 = vmatpush3.msk.msra.mxu1 %vm492_vm5, %v3432_v34  ;;  %4494 = vmatmul.mubr.msk.f32.vlgmr.msra.gmra.mxu0 %vm488_vm7, %v3035_v33 }
0x1073   : > { %4502 = vmatpush3.msk.msra.mxu0 %vm492_vm5, %v3195_v31  ;;  %4503 = vmatprep.mubr.msk.f32.mxu0 %vm4748_vm1, %v4747_v1 }
0x1074   : > { %4511 = vmatprep.subr.mxu0 %v4747_v1  ;;  %4518 = vmatprep.mubr.msk.f32.mxu1 %vm4748_vm1, %v4747_v1 }
0x1075   : > { %4519 = vmatmul.mubr.msk.f32.vlgmr.msra.gmra.mxu1 %vm488_vm7, %v3430_v35  ;;  %4526 = vmatprep.subr.mxu1 %v4747_v1 }
0x1076   : > { %4504 = vmatmul.mubr.msk.f32.vlgmr.msra.gmra.mxu0 %vm488_vm7, %v3193_v36  ;;  %4527 = vmatpush3.msk.msra.mxu1 %vm248_vm0, %v5185_v16  ;;  %v3509_v16 = vld [vmem:[%s5532_s1 + $0x1d8] sm:$0xf]  ;;  %vm3678_vm0 = vcmask 125952  }
0x1077   : > { %4512 = vmatpush3.msk.msra.mxu0 %vm492_vm5, %v3353_v37  ;;  %4513 = vmatprep.mubr.msk.f32.mxu0 %vm4748_vm1, %v4747_v1 }
0x1078   : > { %4521 = vmatprep.subr.mxu0 %v4747_v1  ;;  %4528 = vmatprep.subr.mxu1 %v4747_v1 }
0x1079   : > { %4529 = vmatpush3.msra.mxu1 %v5190_v7  ;;  %4534 = vmatprep.mubr.msk.f32.mxu1 %vm4748_vm1, %v4747_v1 }
0x107a   : > { %4514 = vmatmul.mubr.msk.f32.vlgmr.msra.gmra.mxu0 %vm488_vm7, %v3351_v38  ;;  %4530 = vmatprep.subr.mxu1 %v4747_v1 }
0x107b   : > { %4522 = vmatpush3.msk.msra.mxu0 %vm492_vm5, %v3511_v39  ;;  %4523 = vmatprep.mubr.msk.f32.mxu0 %vm4748_vm1, %v4747_v1 }
0x107c   : > { %4531 = vmatpush3.msra.mxu1 %v5198_v17  ;;  %4537 = vmatprep.subr.mxu0 %v4747_v1 }
0x107d   : > { %4532 = vmatprep.subr.mxu1 %v4747_v1 }
0x107e   : > { %4524 = vmatmul.mubr.msk.f32.vlgmr.msra.gmra.mxu0 %vm488_vm7, %v3509_v16  ;;  %4533 = vmatpush3.msra.mxu1 %v5207_v20 }
0x107f   : > { %4541 = vmatprep.mubr.msk.f32.mxu0 %vm4748_vm1, %v4747_v1  ;;  %4538 = vmatpush3.msra.mxu0 %v2070_v25 }
0x1080   : > { %4539 = vmatprep.subr.mxu0 %v4747_v1 }
0x1121   : > { %v2706_v7 = vpop.f32.mrf.mxu1 }
0x1123   : > { %v4470_v41 = vpop.f32.mrf.mxu1 }
0x1124   : > { %v2069_v41 = vld [vmem:[%s5532_s1 + $0x158] sm:$0xff] }
0x1125   : > { %v2873_v0 = vpop.f32.mrf.mxu1  ;;  %4540 = vmatpush3.msra.mxu0 %v2069_v41 }
0x1126   : > { %v2633_v17 = vpop.f32.mrf.mxu0  ;;  %4544 = vmatprep.subr.mxu0 %v4747_v1 }
0x1127   : > { %v2707_v43 = vadd.f32 %v2706_v7, %v2633_v17  ;;  %v4480_v3 = vpop.f32.mrf.mxu1 }
0x1128   : > { %v4465_v6 = vpop.f32.mrf.mxu0 }
0x1129   : > { %v2710_v20 = vadd.f32 %v2707_v43, %v5240_v30  ;;  %v3030_v44 = vpop.f32.mrf.mxu1  ;;  %v3696_v6 = vrot.slane %v5400_v42, %v1863_v9  ;;  %v2073_v9 = vld [vmem:[%s5532_s1 + $0x178] sm:$0xff] }
0x112a   : > { %v2798_v10 = vpop.f32.mrf.mxu0 }
0x112b   : > { %v2715_v46 = vadd.f32 %v2714_v2, %v2710_v20  ;;  %v2874_v11 = vadd.f32 %v2873_v0, %v2798_v10  ;;  %v4490_v47 = vpop.f32.mrf.mxu1  ;;  %v3701_v10 = vrot.slane %v5400_v42, %v1868_v45  ;;  %v2072_v45 = vld [vmem:[%s5532_s1 + $0x170] sm:$0xff] }
0x112c   : > { %v4475_v12 = vpop.f32.mrf.mxu0  ;;  %v2074_v47 = vld [vmem:[%s5532_s1 + $0x180] sm:$0xff] }
0x112d   : > { %v3679_v48 = vsel %vm3678_vm0, %v2715_v46, 0.0  ;;  %v3188_v49 = vpop.f32.mrf.mxu1  ;;  %v2071_v12 = vld [vmem:[%s5532_s1 + $0x168] sm:$0xff] }
0x112e   : > { %3680 = vadd.xlane.f32.xlu0 %v3679_v48  ;;  %v2951_v50 = vpop.f32.mrf.mxu0 }
0x112f   : > { %v2955_v51 = vadd.f32 %v2951_v50, %v2874_v11  ;;  %v4500_v52 = vpop.f32.mrf.mxu1 }
0x1130   : > { %v4485_v53 = vpop.f32.mrf.mxu0  ;;  %v3706_v52 = vrot.slane %v5400_v42, %v1873_v40 }
0x1131   : > { %v3034_v57 = vadd.f32 %v3030_v44, %v2955_v51  ;;  %v3346_v54 = vpop.f32.mrf.mxu1 }
0x1132   : > { %v3109_v55 = vpop.f32.mrf.mxu0 }
0x1133   : > { %v3113_v59 = vadd.f32 %v3109_v55, %v3034_v57  ;;  %v4510_v30 = vpop.f32.mrf.mxu1 }
0x1134   : > { %v4495_v60 = vpop.f32.mrf.mxu0 }
0x1135   : > { %v3192_v61 = vadd.f32 %v3188_v49, %v3113_v59  ;;  %v3504_v14 = vpop.f32.mrf.mxu1 }
0x1136   : > { %v3267_v63 = vpop.f32.mrf.mxu0 }
0x1137   : > { %v3271_v4 = vadd.f32 %v3267_v63, %v3192_v61  ;;  %v4520_v19 = vpop.f32.mrf.mxu1 }
0x1138   : > { %v4505_v5 = vpop.f32.mrf.mxu0 }
0x1139   : > { %v3350_v8 = vadd.f32 %v3346_v54, %v3271_v4 }
0x113a   : > { %v3425_v13 = vpop.f32.mrf.mxu0 }
0x113b   : > { %v3429_v15 = vadd.f32 %v3425_v13, %v3350_v8 }
0x113c   : > { %v4515_v18 = vpop.f32.mrf.mxu0 }
0x113d   : > { %v3508_v22 = vadd.f32 %v3504_v14, %v3429_v15 }
0x113e   : > { %v3583_v23 = vpop.f32.mrf.mxu0 }
0x113f   : > { %v3587_v24 = vadd.f32 %v3583_v23, %v3508_v22 }
0x1140   : > { %v4525_v26 = vpop.f32.mrf.mxu0 }
0x1144   : > { %3590 = vperm.xlu0 %4618, %v2076_v27  }
0x1163   : > { %2056 = vadd.xlane.f32.xlu0 %v2055_v29 }
0x11b7   : > { %v3681_v58 = vpop.xlane.xlu0 %3680 }
0x11b8   : > { %v3683_v31 = vmul.f32 0.0625, %v3681_v58 }
0x11ba   : > { %v3684_v32 = vsub.f32 %v2715_v46, %v3683_v31 }
0x11bc   : > { %v3685_v33 = vmul.f32 %v3684_v32, %v3684_v32 }
0x11be   : > { %v3686_v34 = vsel %vm3678_vm0, %v3685_v33, 0.0 }
0x11bf   : > { %3687 = vadd.xlane.f32.xlu1 %v3686_v34  ;;  %v3591_v35 = vpop.permute.xlu0 %3590 }
0x11c0   : > { %v3593_v36 = vadd.f32 %v3591_v35, %v3587_v24 }
0x11c2   : > { %v3595_v37 = vmin.f32 %v3593_v36, 0.0  ;;  %vm3594_vm2 = vcmp.gt.f32.partialorder %v3593_v36, 0.0 }
0x11c4   : > { %v3596_v38 = vmul.f32 1.442695, %v3595_v37 }
0x11c6   : > { %4643 = vpow2.f32 %v3596_v38 }
0x11d3   : > { %v4644_v39 = vpop.eup %4643 }
0x11d4   : > { %v4134_v16 = vadd.f32 -1.0, %v4644_v39 }
0x11d6   : > { %v3599_v7 = vsel %vm3594_vm2, %v3593_v36, %v4134_v16 }
0x11d7   : > { %3601 = vrot.lane.b32.xlu1 %v3599_v7, %s4749_s29  ;;  %s3898_s29 = scalar_lea.sflag [#allocation3], %s5217_s12 }
0x1248   : > { %v3688_v0 = vpop.xlane.xlu1 %3687 }
0x1249   : > { %v3689_v17 = vmul.f32 0.0625, %v3688_v0 }
0x124b   : > { %v3690_v43 = vadd.f32 1e-05, %v3689_v17 }
0x124c   : > { %v3602_v2 = vpop.permute.xlu1 %3601 }
0x124d   : > { %4645 = vrsqrt.f32 %v3690_v43  ;;  %v3604_v3 = vmax.f32 %v3599_v7, %v3602_v2 }
0x124f   : > { %4535 = vmatmul.mubr.msk.f32.vlgmr.msra.gmra.mxu1 %vm2082_vm13, %v3604_v3 }
0x125a   : > { %v4646_v20 = vpop.eup %4645 }
0x125b   : > { %v3692_v44 = vmul.f32 %v4646_v20, %v3684_v32  ;;  %v2057_v32 = vpop.xlane.xlu0 %2056 }
0x125c   : > { %v2058_v33 = vmul.f32 0.03125, %v2057_v32 }
0x125d   : > { %v3697_v46 = vmul.f32 %v3696_v6, %v3692_v44 }
0x125f   : > { %v3702_v11 = vadd.f32 %v3701_v10, %v3697_v46 }
0x1261   : > { %4542 = vmatmul.mubr.msk.f32.vlgmr.msra.gmra.mxu0 %vm2159_vm14, %v3702_v11 }
0x1262   : > { %4552 = vmatprep.mubr.msk.f32.mxu0 %vm4748_vm1, %v4747_v1  ;;  %4545 = vmatpush3.msra.mxu0 %v2074_v47 }
0x1263   : > { %4546 = vmatprep.subr.mxu0 %v4747_v1 }
0x1264   : > { %4547 = vmatpush3.msra.mxu0 %v2073_v9 }
0x1265   : > { %4548 = vmatprep.subr.mxu0 %v4747_v1 }
0x1266   : > { %4549 = vmatpush3.msra.mxu0 %v2072_v45 }
0x1267   : > { %4550 = vmatprep.subr.mxu0 %v4747_v1 }
0x1268   : > { %4551 = vmatpush3.msra.mxu0 %v2071_v12 }
0x130f   : > { %v5448_v48 = vpop.f32.mrf.mxu1 }
0x1310   : > { %v3886_v49 = vmul.f32 %v5448_v48, %v5448_v48 }
0x1311   : > { %v4536_v50 = vpop.f32.mrf.mxu1 }
0x1312   : > { %v3887_v51 = vsel %vm3678_vm0, %v3886_v49, 0.0 }
0x1313   : > { %3888 = vadd.xlane.f32.xlu1 %v3887_v51 }
0x1321   : > { %v3776_v53 = vpop.f32.mrf.mxu0 }
0x1322   : > { %v3777_v57 = vadd.f32 %v3776_v53, %v3706_v52 }
0x1323   : > { %v4543_v54 = vpop.f32.mrf.mxu0 }
0x1324   : > { %v3781_v55 = vmul.f32 0.70710677, %v3777_v57  ;;  %v3780_v29 = vmul.f32 0.5, %v3777_v57 }
0x1326   : > { %v3784_v59 = vand.u32 2147483647, %v3781_v55  ;;  %vm3782_vm1 = vcmp.ge.f32.partialorder %v3781_v55, 0.0 }
0x1327   : > { %v3783_v27 = vsel %vm3782_vm1, 1.0, %v4765_v62 }
0x1328   : > { %v3785_v1 = vmul.f32 0.3275911, %v3784_v59  ;;  %v3798_v60 = vsub.f32 0.0, %v3784_v59 }
0x132a   : > { %v3786_v30 = vadd.f32 1.0, %v3785_v1  ;;  %v3799_v61 = vmul.f32 %v3798_v60, %v3784_v59 }
0x132c   : > { %4647 = vrcp.f32 %v3786_v30  ;;  %v3800_v5 = vmul.f32 1.442695, %v3799_v61 }
0x132e   : > { %4649 = vpow2.f32 %v3800_v5 }
0x1339   : > { %v4648_v63 = vpop.eup %4647 }
0x133a   : > { %v3789_v4 = vmul.f32 1.0614054, %v4648_v63 }
0x133b   : > { %v4650_v23 = vpop.eup %4649 }
0x133c   : > { %v3790_v8 = vadd.f32 -1.4531521, %v3789_v4 }
0x133e   : > { %v3791_v13 = vmul.f32 %v4648_v63, %v3790_v8 }
0x1340   : > { %v3792_v14 = vadd.f32 1.4214138, %v3791_v13 }
0x1342   : > { %v3793_v15 = vmul.f32 %v4648_v63, %v3792_v14 }
0x1344   : > { %v3794_v18 = vadd.f32 -0.28449672, %v3793_v15 }
0x1346   : > { %v3795_v40 = vmul.f32 %v4648_v63, %v3794_v18 }
0x1348   : > { %v3796_v19 = vadd.f32 0.2548296, %v3795_v40 }
0x134a   : > { %v3797_v22 = vmul.f32 %v4648_v63, %v3796_v19 }
0x134c   : > { %v3802_v24 = vmul.f32 %v4650_v23, %v3797_v22 }
0x134e   : > { %v3803_v26 = vsub.f32 1.0, %v3802_v24 }
0x1350   : > { %v3804_v28 = vmul.f32 %v3803_v26, %v3783_v27 }
0x1352   : > { %v3805_v58 = vadd.f32 1.0, %v3804_v28 }
0x1354   : > { %v3806_v31 = vmul.f32 %v3805_v58, %v3780_v29 }
0x1356   : > { %4553 = vmatmul.mubr.msk.f32.vlgmr.msra.gmra.mxu0 %vm322_vm3, %v3806_v31 }
0x139c   : > { %v3889_v34 = vpop.xlane.xlu1 %3888 }
0x139d   : > { %4668 = shalt.err (!%p4665_p3)
}
0x139e   : > { %s4669_s10 = scalar_lea.hbm %s5464_s23, 64  ;;  %s4673_s27 = scalar_lea.hbm %s5533_s2, 128 }
0x139f   : > { %p4670_p4 = scmp.ne.s32.totalorder %s5464_s23, %s4669_s10  ;;  %p4674_p9 = scmp.lt.s32.totalorder %s5464_s23, %s5533_s2 }
0x13a0   : > { %p4675_p10 = scmp.lt.s32.totalorder %s4673_s27, %s4669_s10 }
0x13a1   : > { %p4671_p7 = pnand %p4670_p4, %p4831_p5 }
0x13a2   : > { %p4676_p11 = por %p4675_p10, %p4674_p9 }
0x13a3   : > { %p4672_p8 = pneg %p4671_p7 }
0x13a5   : > { %p4677_p12 = pnand %p4676_p11, %p4672_p8 }
0x13a7   : > { %4680 = shalt.err (!%p4677_p12)
}
0x13a8   : > { %4555 = dma.vmem_to_hbm [thread:$0]  (%p4831_p5), %s3921_s28, 64, %s5464_s23, %s3898_s29   ;;  %4651 = vlog2.f32 %v2058_v33  ;;  %v3890_v62 = vmul.f32 0.0625, %v3889_v34  ;;  %vm3893_vm3 = vcmask 7168   ;;  %vm3895_vm4 = vcmask 11264  }
0x13a9   : > { %s5549_s30 = sshll.u32 %s4855_s5, 2  ;;  %v3810_v16 = vrot.slane %v5400_v42, %v1977_v21  ;;  %s199_s23 = scalar_lea.vmem [#allocation4], %s4055_s6 }
0x13aa   : > { %4653 = vlog2.f32 %v3890_v62  ;;  %s213_s8 = scalar_lea.vmem %s5535_s4, %s5549_s30  ;;  %s3933_s28 = sshll.u32 %s199_s23, 4  ;;  %s3934_s28 = int_to_ptr.vmem [resolvable:$true] %s3933_s28 }
0x13ab   : > { %s3931_s10 = scalar_lea.hbm %s5534_s3, %s4141_s11  ;;  %s3903_s9 = scalar_lea.sflag [#allocation5], %s5217_s12 }
0x13ac   : > { %s4681_s20 = scalar_lea.vmem %s3934_s28, 64  ;;  %s4767_s6 = smov [#allocation4]  }
0x13ad   : > { %p4682_p13 = scmp.ne.s32.totalorder %s3934_s28, %s4681_s20  ;;  %s4685_s27 = sshll.u32 %s4767_s6, 4  ;;  %s4686_s27 = int_to_ptr.vmem [resolvable:$false] %s4685_s27 }
0x13ae   : > { %s4687_s14 = scalar_lea.vmem %s4686_s27, 128  ;;  %p4688_p2 = scmp.lt.s32.totalorder %s3934_s28, %s4686_s27 }
0x13af   : > { %p4683_p0 = pnand %p4682_p13, %p4831_p5  ;;  %p4689_p3 = scmp.lt.s32.totalorder %s4687_s14, %s4681_s20 }
0x13b1   : > { %p4684_p1 = pneg %p4683_p0  ;;  %p4690_p4 = por %p4689_p3, %p4688_p2 }
0x13b3   : > { %p4691_p7 = pnand %p4690_p4, %p4684_p1 }
0x13b5   : > { %v4652_v35 = vpop.eup %4651 }
0x13b6   : > { %v2060_v37 = vmul.f32 0.6931472, %v4652_v35 }
0x13b7   : > { %v4654_v36 = vpop.eup %4653 }
0x13b8   : > { %v3892_v38 = vmul.f32 0.6931472, %v4654_v36 }
0x13ba   : > { %v3894_v39 = vsel %vm3893_vm3, %v2060_v37, %v3892_v38 }
0x13bb   : > { %3896 = vst.msk [vmem:[%s213_s8] sm:$0xf] %vm3895_vm4, %v3894_v39 }
0x1416   : > { %v3880_v7 = vpop.f32.mrf.mxu0 }
0x1417   : > { %v3881_v25 = vadd.f32 %v3880_v7, %v3810_v16 }
0x1418   : > { %v4554_v41 = vpop.f32.mrf.mxu0 }
0x1419   : > { %v3884_v0 = vadd.f32 %v3881_v25, %v5448_v48 }
0x141b   : > { %3885 = vst.msk [vmem:[%s199_s23] sm:$0xf] %vm3678_vm0, %v3884_v0 }
0x141c   : > { %4694 = shalt.err (!%p4691_p7)
}
0x141d   : > { %s4695_s19 = scalar_lea.hbm %s3931_s10, 64  ;;  %s4699_s22 = scalar_lea.hbm %s5534_s3, 128 }
0x141e   : > { %p4696_p8 = scmp.ne.s32.totalorder %s3931_s10, %s4695_s19  ;;  %p4700_p11 = scmp.lt.s32.totalorder %s3931_s10, %s5534_s3 }
0x141f   : > { %p4701_p12 = scmp.lt.s32.totalorder %s4699_s22, %s4695_s19 }
0x1420   : > { %p4697_p9 = pnand %p4696_p8, %p4831_p5 }
0x1421   : > { %p4702_p13 = por %p4701_p12, %p4700_p11 }
0x1422   : > { %p4698_p10 = pneg %p4697_p9 }
0x1424   : > { %p4703_p0 = pnand %p4702_p13, %p4698_p10 }
0x1426   : > { %4706 = shalt.err (!%p4703_p0)
}
0x1427   : > { %4556 = dma.vmem_to_hbm [thread:$0]  (%p4831_p5), %s3934_s28, 64, %s3931_s10, %s3903_s9  }
0x1428 PF: > { %p4566_p1 = scmp.ge.s32.totalorder %s4745_s18, 2  ;;  %s3948_s7 = sand.u32 1, %s4733_s15  }
0x1429   : > { %s3949_s8 = scalar_lea.sflag [#allocation3], %s3948_s7 }
0x142a   : > { %p4560_p2 = pnand %p4566_p1, %p4835_p6 }
0x142c   : > { %p4561_p3 = pneg %p4560_p2 }
0x142e   : > { %4724 = dma.done.wait (%p4561_p3), %s3949_s8, 64  }
0x142f   : > { %4726 = vsyncadd (%p4561_p3), %s3949_s8, 4294967232  ;;  %s3958_s23 = scalar_lea.sflag [#allocation5], %s3948_s7 }
0x1430   : > { %4728 = dma.done.wait (%p4561_p3), %s3958_s23, 64  }
0x1431   : > { %4730 = vsyncadd (%p4561_p3), %s3958_s23, 4294967232  ;;  %p18_p5 = scmp.ge.s32.totalorder %s4818_s21, 4   ;;  %s5550_s15 = smov %s4737_s16 }
0x1432   : > { %s5551_s16 = smov %s4741_s17  ;;  %s5552_s17 = smov %s4829_s24 }
0x1433   : > { %s5553_s18 = smov %s4818_s21  ;;  %20 = sbr.rel (!%p18_p5) target bundleno = 5 (0x5), region = 92 }
0x1438   :  { %3970 = vsyncpa [#allocation3], 1 }
0x1439   :  { %3972 = vsyncpa [#allocation3 + $0x1], 1 }
0x143a   :  { %3973 = vsyncpa [#allocation5], 1 }
0x143b   :  { %3975 = vsyncpa [#allocation5 + $0x1], 1 }

</bundles_post_ra>
